<compile_context>
chip_gen: v7x
topology: tpu7x:2x2x1
jax: 0.10.0
libtpu: 0.0.40
codegen_flags: <defaults>
</compile_context>

<pallas_src>
import math

import jax
import jax.numpy as jnp
from jax import lax
from jax.experimental import pallas as pl
from jax.experimental.pallas import tpu as pltpu

# Cast the conv-matmul MXU operands to this dtype (accumulation is always f32).
# Set to jnp.bfloat16 on v6e/v7x for ~2x MXU throughput at a tiny numerical
# perturbation; default float32 preserves the PyTorch module's numerics.
CONV_MATMUL_DTYPE = jnp.float32


# ----------------------------------------------------------------------------- LSTM
def lstm_kernel(x_ref, wih_ref, whh_ref, b_ref, tgt_ref, out_ref):
    # x_ref   : (1, T*B, Din)  time-major input (row t*B + b); already reversed
    #                          in time for the backward direction.
    # wih_ref : (1, Din, 4H)   packed input->gate weights, gate order i,f,g,o.
    # whh_ref : (1, H,   4H)   packed hidden->gate weights.
    # b_ref   : (1, 1,   4H)   b_ih + b_hh.
    # tgt_ref : (1, B, 2) i32  per-row capture timesteps [t_start, t_end].
    # out_ref : (1, 2, B, H)   h at t_start (slot 0) and t_end (slot 1).
    TB = x_ref.shape[1]
    B, H = out_ref.shape[2], out_ref.shape[3]
    T = TB // B

    # Hoisted input projection: one (T*B, Din) x (Din, 4H) matmul covering all
    # timesteps and all four gates (replaces 4*T tiny K=32, N=16 matmuls).
    xp = (jnp.dot(x_ref[0], wih_ref[0], preferred_element_type=jnp.float32)
          + b_ref[0])                                       # (T*B, 4H)

    tgt = tgt_ref[0]                                        # (B, 2) int32
    t_start = tgt[:, 0:1]                                   # (B, 1)
    t_end = tgt[:, 1:2]
    whh = whh_ref[0]                                        # (H, 4H)

    h = jnp.zeros((B, H), jnp.float32)
    c = jnp.zeros((B, H), jnp.float32)
    h_start = jnp.zeros((B, H), jnp.float32)
    h_end = jnp.zeros((B, H), jnp.float32)

    # T is small and static -> fully unrolled straight-line recurrence.
    for t in range(T):
        gates = xp[t * B:(t + 1) * B, :] + jnp.dot(
            h, whh, preferred_element_type=jnp.float32)     # (B, 4H)
        i_g = jax.nn.sigmoid(gates[:, 0 * H:1 * H])
        f_g = jax.nn.sigmoid(gates[:, 1 * H:2 * H])
        g_g = jnp.tanh(gates[:, 2 * H:3 * H])
        o_g = jax.nn.sigmoid(gates[:, 3 * H:4 * H])
        c = f_g * c + i_g * g_g
        h = o_g * jnp.tanh(c)
        # Capture the only two timesteps encode_query consumes.
        h_start = jnp.where(t_start == t, h, h_start)
        h_end = jnp.where(t_end == t, h, h_end)

    out_ref[0, 0, :, :] = h_start
    out_ref[0, 1, :, :] = h_end


def lstm_endpoints(x, wordlens, fwd_params, bwd_params):
    """Runs the (bi)directional LSTM and returns (num_dir, 2, B, H):
    hidden state at t=0 ("start") and t=wordlen-1 ("end") per direction."""
    B, T, Din = x.shape

    def pack(p):
        w_ih, w_hh, b_ih, b_hh = p   # PyTorch: (4H,Din), (4H,H), (4H,), (4H,)
        return w_ih.T, w_hh.T, (b_ih + b_hh)[None, :]

    wl = wordlens.astype(jnp.int32)
    x_f = jnp.transpose(x, (1, 0, 2)).reshape(T * B, Din)
    dirs = [(x_f, *pack(fwd_params),
             jnp.stack([jnp.zeros_like(wl), wl - 1], axis=-1))]
    if bwd_params is not None:
        # Backward direction: feed the time-reversed sequence; in reversed time
        # the original position t sits at T-1-t, so start -> T-1, end -> T-wl.
        x_b = jnp.transpose(x[:, ::-1, :], (1, 0, 2)).reshape(T * B, Din)
        dirs.append((x_b, *pack(bwd_params),
                     jnp.stack([jnp.full_like(wl, T - 1), T - wl], axis=-1)))

    x_s = jnp.stack([d[0] for d in dirs])
    wih_s = jnp.stack([d[1] for d in dirs])
    whh_s = jnp.stack([d[2] for d in dirs])
    b_s = jnp.stack([d[3] for d in dirs])
    tgt_s = jnp.stack([d[4] for d in dirs]).astype(jnp.int32)

    num_dir = len(dirs)
    H = whh_s.shape[1]
    G = 4 * H

    return pl.pallas_call(
        lstm_kernel,
        grid=(num_dir,),
        in_specs=[pl.BlockSpec((1, T * B, Din), lambda d: (d, 0, 0)),
                  pl.BlockSpec((1, Din, G), lambda d: (d, 0, 0)),
                  pl.BlockSpec((1, H, G), lambda d: (d, 0, 0)),
                  pl.BlockSpec((1, 1, G), lambda d: (d, 0, 0)),
                  pl.BlockSpec((1, B, 2), lambda d: (d, 0, 0))],
        out_specs=pl.BlockSpec((1, 2, B, H), lambda d: (d, 0, 0, 0)),
        out_shape=jax.ShapeDtypeStruct((num_dir, 2, B, H), jnp.float32),
        compiler_params=pltpu.CompilerParams(
            dimension_semantics=("parallel",)),
    )(x_s, wih_s, whh_s, b_s, tgt_s)


# ----------------------------------------------------------------------------- conv kernels
def conv5_bn_tanh_kernel(p_ref, w_ref, b_ref, gamma_ref, beta_ref, o_ref):
    # p_ref : (25*Cin, Npix)   im2col patches, Npix = B*H*W (lane-dense, 512)
    # w_ref : (Cout, 25*Cin)
    # b_ref / gamma_ref / beta_ref : (Cout, 1)
    # o_ref : (Cout, Npix)     tanh(BN(conv5(x)))
    y = (jnp.dot(w_ref[...], p_ref[...], preferred_element_type=jnp.float32)
         + b_ref[...])                                      # (Cout, Npix) f32
    n = y.shape[1]
    inv_n = 1.0 / n
    mean = jnp.sum(y, axis=1, keepdims=True) * inv_n
    var = jnp.sum(y * y, axis=1, keepdims=True) * inv_n - mean * mean
    var = jnp.maximum(var, 0.0)          # guard E[x^2]-E[x]^2 cancellation
    scale = gamma_ref[...] * lax.rsqrt(var + 1e-5)
    shift = beta_ref[...] - mean * scale
    o_ref[...] = jnp.tanh(y * scale + shift).astype(o_ref.dtype)


def conv3_kernel(p_ref, w_ref, b_ref, o_ref):
    # 3x3 conv as one im2col matmul: (Cout, 9*C) x (9*C, Npix)
    o_ref[...] = (jnp.dot(w_ref[...], p_ref[...],
                          preferred_element_type=jnp.float32)
                  + b_ref[...]).astype(o_ref.dtype)


def _vmem_specs(n):
    return [pl.BlockSpec(memory_space=pltpu.MemorySpace.VMEM) for _ in range(n)]


def conv5_bn_tanh(patches, w_mat, bias, gamma, beta):
    cout, npix = w_mat.shape[0], patches.shape[1]
    # Whole batch in one invocation (N = B*H*W); VMEM footprint here is < 1 MiB.
    # TODO(synk): tile over the pixel axis (and two-pass the BN stats) if
    # spatial/channel sizes ever grow near the v7x 64 MiB VMEM budget.
    return pl.pallas_call(
        conv5_bn_tanh_kernel,
        in_specs=_vmem_specs(5),
        out_specs=pl.BlockSpec(memory_space=pltpu.MemorySpace.VMEM),
        out_shape=jax.ShapeDtypeStruct((cout, npix), jnp.float32),
    )(patches, w_mat, bias, gamma, beta)


def conv3(patches, w_mat, bias):
    cout, npix = w_mat.shape[0], patches.shape[1]
    return pl.pallas_call(
        conv3_kernel,
        in_specs=_vmem_specs(3),
        out_specs=pl.BlockSpec(memory_space=pltpu.MemorySpace.VMEM),
        out_shape=jax.ShapeDtypeStruct((cout, npix), jnp.float32),
    )(patches, w_mat, bias)


# ----------------------------------------------------------------------------- im2col helpers (plain XLA)
def _im2col_nchw(x, k, pad):
    """(B, C, H, W) -> (k*k*C, B*H*W) patch matrix.
    K axis ordered (ky, kx, c); N axis ordered (b, y, x)."""
    B, C, H, W = x.shape
    xp = jnp.pad(x, ((0, 0), (0, 0), (pad, pad), (pad, pad)))
    slabs = [xp[:, :, dy:dy + H, dx:dx + W]
             for dy in range(k) for dx in range(k)]
    p = jnp.stack(slabs, axis=0)                     # (k*k, B, C, H, W)
    p = jnp.transpose(p, (0, 2, 1, 3, 4))            # (k*k, C, B, H, W)
    return p.reshape(k * k * C, B * H * W)


def _conv_weight_matrix(w):
    """PyTorch (Cout, Cin, KH, KW) -> (Cout, KH*KW*Cin), matching _im2col_nchw."""
    cout = w.shape[0]
    return jnp.transpose(w, (0, 2, 3, 1)).reshape(cout, -1)


# ----------------------------------------------------------------------------- full forward
def sim_predictor_forward(params, batch_queries, wordlens, map2d):
    # ----- encode_query -----
    x = batch_queries.astype(jnp.float32)
    ends = lstm_endpoints(x, wordlens,
                          params["lstm"]["fwd"], params["lstm"]["bwd"])
    num_dir = ends.shape[0]
    # (h[t=0] + h[t=wordlen-1]) / 2 per direction, concat (fwd, bwd) = PyTorch
    # bidirectional hidden concatenation order.
    full_queries = jnp.concatenate(
        [(ends[d, 0] + ends[d, 1]) * 0.5 for d in range(num_dir)], axis=-1)
    # fc_full: (B,32)x(32,32) - leave to XLA (per perf review, a dedicated
    # pallas_call here would be pure launch overhead).
    queries = full_queries @ params["fc_w"].T + params["fc_b"]

    # ----- map2d path -----
    x2d = map2d.astype(jnp.float32)                  # NCHW, like PyTorch
    B, cin, Hs, Ws = x2d.shape
    cout = params["conv_w"].shape[0]
    mdt = CONV_MATMUL_DTYPE

    p5 = _im2col_nchw(x2d, 5, 2).astype(mdt)                    # (25*Cin, B*H*W)
    w5 = _conv_weight_matrix(params["conv_w"]).astype(mdt)      # (Cout, 25*Cin)
    act = conv5_bn_tanh(p5, w5,
                        params["conv_b"].reshape(cout, 1),
                        params["bn_gamma"].reshape(cout, 1),
                        params["bn_beta"].reshape(cout, 1))     # (Cout, B*H*W)

    act_nchw = jnp.transpose(act.reshape(cout, B, Hs, Ws), (1, 0, 2, 3))
    p3 = _im2col_nchw(act_nchw, 3, 1).astype(mdt)               # (9*Cout, B*H*W)
    w3 = _conv_weight_matrix(params["conv1_w"]).astype(mdt)     # (Cout, 9*Cout)
    out3 = conv3(p3, w3, params["conv1_b"].reshape(cout, 1))    # (Cout, B*H*W)

    map2d_out = jnp.transpose(out3.reshape(cout, B, Hs, Ws), (1, 0, 2, 3))
    return map2d_out, queries


# ----------------------------------------------------------------------------- deterministic params (PyTorch layouts)
def init_params(key, hidden_size, feat_hidden_size, query_input_size,
                query_hidden_size, bidirectional, num_layers):
    # TODO(synk): stacked LSTMs (num_layers > 1) are not implemented; the
    # endpoint-only LSTM kernel would need a full-sequence variant for the
    # non-final layers.
    assert num_layers == 1

    def u(k, shape, fan):
        bound = 1.0 / math.sqrt(fan)
        return jax.random.uniform(k, shape, jnp.float32, -bound, bound)

    keys = iter(jax.random.split(key, 64))
    qh = query_hidden_size // 2 if bidirectional else query_hidden_size

    def lstm_dir(din):
        return (u(next(keys), (4 * qh, din), qh),   # w_ih, gate order i,f,g,o
                u(next(keys), (4 * qh, qh), qh),    # w_hh
                u(next(keys), (4 * qh,), qh),       # b_ih
                u(next(keys), (4 * qh,), qh))       # b_hh

    params = {"lstm": {"fwd": lstm_dir(query_input_size),
                       "bwd": lstm_dir(query_input_size) if bidirectional else None}}

    params["fc_w"] = u(next(keys), (feat_hidden_size, query_hidden_size),
                       query_hidden_size)
    params["fc_b"] = u(next(keys), (feat_hidden_size,), query_hidden_size)

    params["conv_w"] = u(next(keys), (feat_hidden_size, hidden_size, 5, 5),
                         hidden_size * 25)
    params["conv_b"] = u(next(keys), (feat_hidden_size,), hidden_size * 25)

    params["bn_gamma"] = jnp.ones((feat_hidden_size,), jnp.float32)
    params["bn_beta"] = jnp.zeros((feat_hidden_size,), jnp.float32)

    params["conv1_w"] = u(next(keys), (feat_hidden_size, feat_hidden_size, 3, 3),
                          feat_hidden_size * 9)
    params["conv1_b"] = u(next(keys), (feat_hidden_size,), feat_hidden_size * 9)
    return params


if __name__ == "__main__":
    B, T = 2, 8
    hidden_size = 8            # map2d input channels
    feat_hidden_size = 32
    query_input_size = 32
    query_hidden_size = 32
    bidirectional = True
    num_layers = 1
    N = 16                     # map2d spatial size

    key = jax.random.PRNGKey(0)
    kp, kq, km = jax.random.split(key, 3)

    params = init_params(kp, hidden_size, feat_hidden_size, query_input_size,
                         query_hidden_size, bidirectional, num_layers)

    batch_queries = jax.random.normal(kq, (B, T, query_input_size), jnp.float32)
    wordlens = jnp.array([T, 5], dtype=jnp.int32)
    map2d = jax.random.normal(km, (B, hidden_size, N, N), jnp.float32)  # NCHW

    fwd = jax.jit(sim_predictor_forward)
    map2d_out, queries = fwd(params, batch_queries, wordlens, map2d)
    jax.block_until_ready((map2d_out, queries))

    assert map2d_out.shape == (B, feat_hidden_size, N, N)
    assert queries.shape == (B, feat_hidden_size)
    print("KERNEL_OK")
</pallas_src>

<mosaic_0001>
module attributes {stable_mosaic.version = 11 : i64} {
  func.func @conv5_bn_tanh_kernel(%arg0: memref<200x512xf32, #tpu.memory_space<vmem>>, %arg1: memref<32x200xf32, #tpu.memory_space<vmem>>, %arg2: memref<32x1xf32, #tpu.memory_space<vmem>>, %arg3: memref<32x1xf32, #tpu.memory_space<vmem>>, %arg4: memref<32x1xf32, #tpu.memory_space<vmem>>, %arg5: memref<32x512xf32, #tpu.memory_space<vmem>>) attributes {dimension_semantics = [], scalar_prefetch = 0 : i64, scratch_operands = 0 : i64, tpu.core_type = #tpu.core_type<tc>} {
    %c0 = arith.constant 0 : index
    %c0_0 = arith.constant 0 : index
    %0 = vector.load %arg1[%c0, %c0_0] : memref<32x200xf32, #tpu.memory_space<vmem>>, vector<32x200xf32>
    %c0_1 = arith.constant 0 : index
    %c0_2 = arith.constant 0 : index
    %1 = vector.load %arg0[%c0_1, %c0_2] : memref<200x512xf32, #tpu.memory_space<vmem>>, vector<200x512xf32>
    %cst = arith.constant dense<0.000000e+00> : vector<32x512xf32>
    %2 = tpu.matmul %0, %1, %cst {dimension_numbers = #tpu.dot_dimension_numbers<[1], [0], [0], [1], [0, 0, 1, 1], [], []>} : vector<32x200xf32>, vector<200x512xf32>, vector<32x512xf32> -> vector<32x512xf32>
    %c0_3 = arith.constant 0 : index
    %c0_4 = arith.constant 0 : index
    %3 = vector.load %arg2[%c0_3, %c0_4] : memref<32x1xf32, #tpu.memory_space<vmem>>, vector<32x1xf32>
    %4 = vector.broadcast %3 : vector<32x1xf32> to vector<32x512xf32>
    %5 = arith.addf %2, %4 : vector<32x512xf32>
    %cst_5 = arith.constant dense<0.000000e+00> : vector<32xf32>
    %6 = vector.multi_reduction <add>, %5, %cst_5 [1] : vector<32x512xf32> to vector<32xf32>
    %7 = vector.shape_cast %6 : vector<32xf32> to vector<32x1xf32>
    %cst_6 = arith.constant 0.001953125 : f32
    %8 = vector.broadcast %cst_6 : f32 to vector<32x1xf32>
    %9 = arith.mulf %7, %8 : vector<32x1xf32>
    %10 = arith.mulf %5, %5 : vector<32x512xf32>
    %cst_7 = arith.constant dense<0.000000e+00> : vector<32xf32>
    %11 = vector.multi_reduction <add>, %10, %cst_7 [1] : vector<32x512xf32> to vector<32xf32>
    %12 = vector.shape_cast %11 : vector<32xf32> to vector<32x1xf32>
    %cst_8 = arith.constant 0.001953125 : f32
    %13 = vector.broadcast %cst_8 : f32 to vector<32x1xf32>
    %14 = arith.mulf %12, %13 : vector<32x1xf32>
    %15 = arith.mulf %9, %9 : vector<32x1xf32>
    %16 = arith.subf %14, %15 : vector<32x1xf32>
    %cst_9 = arith.constant 0.000000e+00 : f32
    %17 = vector.broadcast %cst_9 : f32 to vector<32x1xf32>
    %18 = arith.maximumf %16, %17 : vector<32x1xf32>
    %c0_10 = arith.constant 0 : index
    %c0_11 = arith.constant 0 : index
    %19 = vector.load %arg3[%c0_10, %c0_11] : memref<32x1xf32, #tpu.memory_space<vmem>>, vector<32x1xf32>
    %cst_12 = arith.constant 9.99999974E-6 : f32
    %20 = vector.broadcast %cst_12 : f32 to vector<32x1xf32>
    %21 = arith.addf %18, %20 : vector<32x1xf32>
    %22 = math.rsqrt %21 : vector<32x1xf32>
    %23 = arith.mulf %19, %22 : vector<32x1xf32>
    %c0_13 = arith.constant 0 : index
    %c0_14 = arith.constant 0 : index
    %24 = vector.load %arg4[%c0_13, %c0_14] : memref<32x1xf32, #tpu.memory_space<vmem>>, vector<32x1xf32>
    %25 = arith.mulf %9, %23 : vector<32x1xf32>
    %26 = arith.subf %24, %25 : vector<32x1xf32>
    %27 = vector.broadcast %23 : vector<32x1xf32> to vector<32x512xf32>
    %28 = arith.mulf %5, %27 : vector<32x512xf32>
    %29 = vector.broadcast %26 : vector<32x1xf32> to vector<32x512xf32>
    %30 = arith.addf %28, %29 : vector<32x512xf32>
    %31 = math.tanh %30 : vector<32x512xf32>
    %c0_15 = arith.constant 0 : index
    %c0_16 = arith.constant 0 : index
    %32 = vector.load %arg5[%c0_15, %c0_16] : memref<32x512xf32, #tpu.memory_space<vmem>>, vector<32x512xf32>
    tpu.vector_store %arg5[%c0_15, %c0_16], %31 {strides = array<i32>} : memref<32x512xf32, #tpu.memory_space<vmem>>, vector<32x512xf32>,
    return
  }
}

module attributes {stable_mosaic.version = 11 : i64} {
  func.func @conv3_kernel(%arg0: memref<288x512xf32, #tpu.memory_space<vmem>>, %arg1: memref<32x288xf32, #tpu.memory_space<vmem>>, %arg2: memref<32x1xf32, #tpu.memory_space<vmem>>, %arg3: memref<32x512xf32, #tpu.memory_space<vmem>>) attributes {dimension_semantics = [], scalar_prefetch = 0 : i64, scratch_operands = 0 : i64, tpu.core_type = #tpu.core_type<tc>} {
    %c0 = arith.constant 0 : index
    %c0_0 = arith.constant 0 : index
    %0 = vector.load %arg1[%c0, %c0_0] : memref<32x288xf32, #tpu.memory_space<vmem>>, vector<32x288xf32>
    %c0_1 = arith.constant 0 : index
    %c0_2 = arith.constant 0 : index
    %1 = vector.load %arg0[%c0_1, %c0_2] : memref<288x512xf32, #tpu.memory_space<vmem>>, vector<288x512xf32>
    %cst = arith.constant dense<0.000000e+00> : vector<32x512xf32>
    %2 = tpu.matmul %0, %1, %cst {dimension_numbers = #tpu.dot_dimension_numbers<[1], [0], [0], [1], [0, 0, 1, 1], [], []>} : vector<32x288xf32>, vector<288x512xf32>, vector<32x512xf32> -> vector<32x512xf32>
    %c0_3 = arith.constant 0 : index
    %c0_4 = arith.constant 0 : index
    %3 = vector.load %arg2[%c0_3, %c0_4] : memref<32x1xf32, #tpu.memory_space<vmem>>, vector<32x1xf32>
    %4 = vector.broadcast %3 : vector<32x1xf32> to vector<32x512xf32>
    %5 = arith.addf %2, %4 : vector<32x512xf32>
    %c0_5 = arith.constant 0 : index
    %c0_6 = arith.constant 0 : index
    %6 = vector.load %arg3[%c0_5, %c0_6] : memref<32x512xf32, #tpu.memory_space<vmem>>, vector<32x512xf32>
    tpu.vector_store %arg3[%c0_5, %c0_6], %5 {strides = array<i32>} : memref<32x512xf32, #tpu.memory_space<vmem>>, vector<32x512xf32>,
    return
  }
}

module attributes {stable_mosaic.version = 11 : i64} {
  func.func @lstm_kernel(%arg0: i32, %arg1: memref<1x16x32xf32, #tpu.memory_space<vmem>>, %arg2: memref<1x32x64xf32, #tpu.memory_space<vmem>>, %arg3: memref<1x16x64xf32, #tpu.memory_space<vmem>>, %arg4: memref<1x1x64xf32, #tpu.memory_space<vmem>>, %arg5: memref<1x2x2xi32, #tpu.memory_space<vmem>>, %arg6: memref<1x2x2x16xf32, #tpu.memory_space<vmem>>) attributes {dimension_semantics = [#tpu.dimension_semantics<parallel>], iteration_bounds = array<i64: 2>, scalar_prefetch = 0 : i64, scratch_operands = 0 : i64, tpu.core_type = #tpu.core_type<tc>, window_params = [{transform_indices = @transform_0, window_bounds = array<i64: 1, 16, 32>}, {transform_indices = @transform_1, window_bounds = array<i64: 1, 32, 64>}, {transform_indices = @transform_2, window_bounds = array<i64: 1, 16, 64>}, {transform_indices = @transform_3, window_bounds = array<i64: 1, 1, 64>}, {transform_indices = @transform_4, window_bounds = array<i64: 1, 2, 2>}, {transform_indices = @transform_5, window_bounds = array<i64: 1, 2, 2, 16>}]} {
    %c0 = arith.constant 0 : index
    %c0_0 = arith.constant 0 : index
    %c0_1 = arith.constant 0 : index
    %0 = vector.load %arg1[%c0, %c0_0, %c0_1] : memref<1x16x32xf32, #tpu.memory_space<vmem>>, vector<1x16x32xf32>
    %1 = vector.shape_cast %0 : vector<1x16x32xf32> to vector<16x32xf32>
    %c0_2 = arith.constant 0 : index
    %c0_3 = arith.constant 0 : index
    %c0_4 = arith.constant 0 : index
    %2 = vector.load %arg2[%c0_2, %c0_3, %c0_4] : memref<1x32x64xf32, #tpu.memory_space<vmem>>, vector<1x32x64xf32>
    %3 = vector.shape_cast %2 : vector<1x32x64xf32> to vector<32x64xf32>
    %cst = arith.constant dense<0.000000e+00> : vector<16x64xf32>
    %4 = tpu.matmul %1, %3, %cst {dimension_numbers = #tpu.dot_dimension_numbers<[1], [0], [0], [1], [0, 0, 1, 1], [], []>} : vector<16x32xf32>, vector<32x64xf32>, vector<16x64xf32> -> vector<16x64xf32>
    %c0_5 = arith.constant 0 : index
    %c0_6 = arith.constant 0 : index
    %c0_7 = arith.constant 0 : index
    %5 = vector.load %arg4[%c0_5, %c0_6, %c0_7] : memref<1x1x64xf32, #tpu.memory_space<vmem>>, vector<1x1x64xf32>
    %6 = vector.shape_cast %5 : vector<1x1x64xf32> to vector<1x64xf32>
    %7 = vector.broadcast %6 : vector<1x64xf32> to vector<16x64xf32>
    %8 = arith.addf %4, %7 : vector<16x64xf32>
    %c0_8 = arith.constant 0 : index
    %c0_9 = arith.constant 0 : index
    %c0_10 = arith.constant 0 : index
    %9 = vector.load %arg5[%c0_8, %c0_9, %c0_10] : memref<1x2x2xi32, #tpu.memory_space<vmem>>, vector<1x2x2xi32>
    %10 = vector.shape_cast %9 : vector<1x2x2xi32> to vector<2x2xi32>
    %11 = vector.extract_strided_slice %10 {offsets = [0, 0], sizes = [2, 1], strides = [1, 1]} : vector<2x2xi32> to vector<2x1xi32>
    %12 = vector.extract_strided_slice %10 {offsets = [0, 1], sizes = [2, 1], strides = [1, 1]} : vector<2x2xi32> to vector<2x1xi32>
    %c0_11 = arith.constant 0 : index
    %c0_12 = arith.constant 0 : index
    %c0_13 = arith.constant 0 : index
    %13 = vector.load %arg3[%c0_11, %c0_12, %c0_13] : memref<1x16x64xf32, #tpu.memory_space<vmem>>, vector<1x16x64xf32>
    %14 = vector.shape_cast %13 : vector<1x16x64xf32> to vector<16x64xf32>
    %cst_14 = arith.constant 0.000000e+00 : f32
    %15 = vector.broadcast %cst_14 : f32 to vector<2x16xf32>
    %cst_15 = arith.constant 0.000000e+00 : f32
    %16 = vector.broadcast %cst_15 : f32 to vector<2x16xf32>
    %cst_16 = arith.constant 0.000000e+00 : f32
    %17 = vector.broadcast %cst_16 : f32 to vector<2x16xf32>
    %cst_17 = arith.constant 0.000000e+00 : f32
    %18 = vector.broadcast %cst_17 : f32 to vector<2x16xf32>
    %19 = vector.extract_strided_slice %8 {offsets = [0, 0], sizes = [2, 64], strides = [1, 1]} : vector<16x64xf32> to vector<2x64xf32>
    %cst_18 = arith.constant dense<0.000000e+00> : vector<2x64xf32>
    %20 = tpu.matmul %15, %14, %cst_18 {dimension_numbers = #tpu.dot_dimension_numbers<[1], [0], [0], [1], [0, 0, 1, 1], [], []>} : vector<2x16xf32>, vector<16x64xf32>, vector<2x64xf32> -> vector<2x64xf32>
    %21 = arith.addf %19, %20 : vector<2x64xf32>
    %22 = vector.extract_strided_slice %21 {offsets = [0, 0], sizes = [2, 16], strides = [1, 1]} : vector<2x64xf32> to vector<2x16xf32>
    %23 = arith.negf %22 : vector<2x16xf32>
    %24 = math.exp %23 : vector<2x16xf32>
    %cst_19 = arith.constant 1.000000e+00 : f32
    %25 = vector.broadcast %cst_19 : f32 to vector<2x16xf32>
    %26 = arith.addf %25, %24 : vector<2x16xf32>
    %27 = arith.divf %25, %26 : vector<2x16xf32>
    %28 = vector.extract_strided_slice %21 {offsets = [0, 16], sizes = [2, 16], strides = [1, 1]} : vector<2x64xf32> to vector<2x16xf32>
    %29 = arith.negf %28 : vector<2x16xf32>
    %30 = math.exp %29 : vector<2x16xf32>
    %cst_20 = arith.constant 1.000000e+00 : f32
    %31 = vector.broadcast %cst_20 : f32 to vector<2x16xf32>
    %32 = arith.addf %31, %30 : vector<2x16xf32>
    %33 = arith.divf %31, %32 : vector<2x16xf32>
    %34 = vector.extract_strided_slice %21 {offsets = [0, 32], sizes = [2, 16], strides = [1, 1]} : vector<2x64xf32> to vector<2x16xf32>
    %35 = math.tanh %34 : vector<2x16xf32>
    %36 = vector.extract_strided_slice %21 {offsets = [0, 48], sizes = [2, 16], strides = [1, 1]} : vector<2x64xf32> to vector<2x16xf32>
    %37 = arith.negf %36 : vector<2x16xf32>
    %38 = math.exp %37 : vector<2x16xf32>
    %cst_21 = arith.constant 1.000000e+00 : f32
    %39 = vector.broadcast %cst_21 : f32 to vector<2x16xf32>
    %40 = arith.addf %39, %38 : vector<2x16xf32>
    %41 = arith.divf %39, %40 : vector<2x16xf32>
    %42 = arith.mulf %33, %16 : vector<2x16xf32>
    %43 = arith.mulf %27, %35 : vector<2x16xf32>
    %44 = arith.addf %42, %43 : vector<2x16xf32>
    %45 = math.tanh %44 : vector<2x16xf32>
    %46 = arith.mulf %41, %45 : vector<2x16xf32>
    %c0_i32 = arith.constant 0 : i32
    %47 = vector.broadcast %c0_i32 : i32 to vector<2x1xi32>
    %48 = arith.cmpi eq, %11, %47 : vector<2x1xi32>
    %49 = vector.shape_cast %48 : vector<2x1xi1> to vector<2x1xi1>
    %50 = vector.broadcast %49 : vector<2x1xi1> to vector<2x16xi1>
    %51 = arith.select %50, %46, %17 : vector<2x16xi1>, vector<2x16xf32>
    %c0_i32_22 = arith.constant 0 : i32
    %52 = vector.broadcast %c0_i32_22 : i32 to vector<2x1xi32>
    %53 = arith.cmpi eq, %12, %52 : vector<2x1xi32>
    %54 = vector.shape_cast %53 : vector<2x1xi1> to vector<2x1xi1>
    %55 = vector.broadcast %54 : vector<2x1xi1> to vector<2x16xi1>
    %56 = arith.select %55, %46, %18 : vector<2x16xi1>, vector<2x16xf32>
    %57 = vector.extract_strided_slice %8 {offsets = [2, 0], sizes = [2, 64], strides = [1, 1]} : vector<16x64xf32> to vector<2x64xf32>
    %cst_23 = arith.constant dense<0.000000e+00> : vector<2x64xf32>
    %58 = tpu.matmul %46, %14, %cst_23 {dimension_numbers = #tpu.dot_dimension_numbers<[1], [0], [0], [1], [0, 0, 1, 1], [], []>} : vector<2x16xf32>, vector<16x64xf32>, vector<2x64xf32> -> vector<2x64xf32>
    %59 = arith.addf %57, %58 : vector<2x64xf32>
    %60 = vector.extract_strided_slice %59 {offsets = [0, 0], sizes = [2, 16], strides = [1, 1]} : vector<2x64xf32> to vector<2x16xf32>
    %61 = arith.negf %60 : vector<2x16xf32>
    %62 = math.exp %61 : vector<2x16xf32>
    %cst_24 = arith.constant 1.000000e+00 : f32
    %63 = vector.broadcast %cst_24 : f32 to vector<2x16xf32>
    %64 = arith.addf %63, %62 : vector<2x16xf32>
    %65 = arith.divf %63, %64 : vector<2x16xf32>
    %66 = vector.extract_strided_slice %59 {offsets = [0, 16], sizes = [2, 16], strides = [1, 1]} : vector<2x64xf32> to vector<2x16xf32>
    %67 = arith.negf %66 : vector<2x16xf32>
    %68 = math.exp %67 : vector<2x16xf32>
    %cst_25 = arith.constant 1.000000e+00 : f32
    %69 = vector.broadcast %cst_25 : f32 to vector<2x16xf32>
    %70 = arith.addf %69, %68 : vector<2x16xf32>
    %71 = arith.divf %69, %70 : vector<2x16xf32>
    %72 = vector.extract_strided_slice %59 {offsets = [0, 32], sizes = [2, 16], strides = [1, 1]} : vector<2x64xf32> to vector<2x16xf32>
    %73 = math.tanh %72 : vector<2x16xf32>
    %74 = vector.extract_strided_slice %59 {offsets = [0, 48], sizes = [2, 16], strides = [1, 1]} : vector<2x64xf32> to vector<2x16xf32>
    %75 = arith.negf %74 : vector<2x16xf32>
    %76 = math.exp %75 : vector<2x16xf32>
    %cst_26 = arith.constant 1.000000e+00 : f32
    %77 = vector.broadcast %cst_26 : f32 to vector<2x16xf32>
    %78 = arith.addf %77, %76 : vector<2x16xf32>
    %79 = arith.divf %77, %78 : vector<2x16xf32>
    %80 = arith.mulf %71, %44 : vector<2x16xf32>
    %81 = arith.mulf %65, %73 : vector<2x16xf32>
    %82 = arith.addf %80, %81 : vector<2x16xf32>
    %83 = math.tanh %82 : vector<2x16xf32>
    %84 = arith.mulf %79, %83 : vector<2x16xf32>
    %c1_i32 = arith.constant 1 : i32
    %85 = vector.broadcast %c1_i32 : i32 to vector<2x1xi32>
    %86 = arith.cmpi eq, %11, %85 : vector<2x1xi32>
    %87 = vector.shape_cast %86 : vector<2x1xi1> to vector<2x1xi1>
    %88 = vector.broadcast %87 : vector<2x1xi1> to vector<2x16xi1>
    %89 = arith.select %88, %84, %51 : vector<2x16xi1>, vector<2x16xf32>
    %c1_i32_27 = arith.constant 1 : i32
    %90 = vector.broadcast %c1_i32_27 : i32 to vector<2x1xi32>
    %91 = arith.cmpi eq, %12, %90 : vector<2x1xi32>
    %92 = vector.shape_cast %91 : vector<2x1xi1> to vector<2x1xi1>
    %93 = vector.broadcast %92 : vector<2x1xi1> to vector<2x16xi1>
    %94 = arith.select %93, %84, %56 : vector<2x16xi1>, vector<2x16xf32>
    %95 = vector.extract_strided_slice %8 {offsets = [4, 0], sizes = [2, 64], strides = [1, 1]} : vector<16x64xf32> to vector<2x64xf32>
    %cst_28 = arith.constant dense<0.000000e+00> : vector<2x64xf32>
    %96 = tpu.matmul %84, %14, %cst_28 {dimension_numbers = #tpu.dot_dimension_numbers<[1], [0], [0], [1], [0, 0, 1, 1], [], []>} : vector<2x16xf32>, vector<16x64xf32>, vector<2x64xf32> -> vector<2x64xf32>
    %97 = arith.addf %95, %96 : vector<2x64xf32>
    %98 = vector.extract_strided_slice %97 {offsets = [0, 0], sizes = [2, 16], strides = [1, 1]} : vector<2x64xf32> to vector<2x16xf32>
    %99 = arith.negf %98 : vector<2x16xf32>
    %100 = math.exp %99 : vector<2x16xf32>
    %cst_29 = arith.constant 1.000000e+00 : f32
    %101 = vector.broadcast %cst_29 : f32 to vector<2x16xf32>
    %102 = arith.addf %101, %100 : vector<2x16xf32>
    %103 = arith.divf %101, %102 : vector<2x16xf32>
    %104 = vector.extract_strided_slice %97 {offsets = [0, 16], sizes = [2, 16], strides = [1, 1]} : vector<2x64xf32> to vector<2x16xf32>
    %105 = arith.negf %104 : vector<2x16xf32>
    %106 = math.exp %105 : vector<2x16xf32>
    %cst_30 = arith.constant 1.000000e+00 : f32
    %107 = vector.broadcast %cst_30 : f32 to vector<2x16xf32>
    %108 = arith.addf %107, %106 : vector<2x16xf32>
    %109 = arith.divf %107, %108 : vector<2x16xf32>
    %110 = vector.extract_strided_slice %97 {offsets = [0, 32], sizes = [2, 16], strides = [1, 1]} : vector<2x64xf32> to vector<2x16xf32>
    %111 = math.tanh %110 : vector<2x16xf32>
    %112 = vector.extract_strided_slice %97 {offsets = [0, 48], sizes = [2, 16], strides = [1, 1]} : vector<2x64xf32> to vector<2x16xf32>
    %113 = arith.negf %112 : vector<2x16xf32>
    %114 = math.exp %113 : vector<2x16xf32>
    %cst_31 = arith.constant 1.000000e+00 : f32
    %115 = vector.broadcast %cst_31 : f32 to vector<2x16xf32>
    %116 = arith.addf %115, %114 : vector<2x16xf32>
    %117 = arith.divf %115, %116 : vector<2x16xf32>
    %118 = arith.mulf %109, %82 : vector<2x16xf32>
    %119 = arith.mulf %103, %111 : vector<2x16xf32>
    %120 = arith.addf %118, %119 : vector<2x16xf32>
    %121 = math.tanh %120 : vector<2x16xf32>
    %122 = arith.mulf %117, %121 : vector<2x16xf32>
    %c2_i32 = arith.constant 2 : i32
    %123 = vector.broadcast %c2_i32 : i32 to vector<2x1xi32>
    %124 = arith.cmpi eq, %11, %123 : vector<2x1xi32>
    %125 = vector.shape_cast %124 : vector<2x1xi1> to vector<2x1xi1>
    %126 = vector.broadcast %125 : vector<2x1xi1> to vector<2x16xi1>
    %127 = arith.select %126, %122, %89 : vector<2x16xi1>, vector<2x16xf32>
    %c2_i32_32 = arith.constant 2 : i32
    %128 = vector.broadcast %c2_i32_32 : i32 to vector<2x1xi32>
    %129 = arith.cmpi eq, %12, %128 : vector<2x1xi32>
    %130 = vector.shape_cast %129 : vector<2x1xi1> to vector<2x1xi1>
    %131 = vector.broadcast %130 : vector<2x1xi1> to vector<2x16xi1>
    %132 = arith.select %131, %122, %94 : vector<2x16xi1>, vector<2x16xf32>
    %133 = vector.extract_strided_slice %8 {offsets = [6, 0], sizes = [2, 64], strides = [1, 1]} : vector<16x64xf32> to vector<2x64xf32>
    %cst_33 = arith.constant dense<0.000000e+00> : vector<2x64xf32>
    %134 = tpu.matmul %122, %14, %cst_33 {dimension_numbers = #tpu.dot_dimension_numbers<[1], [0], [0], [1], [0, 0, 1, 1], [], []>} : vector<2x16xf32>, vector<16x64xf32>, vector<2x64xf32> -> vector<2x64xf32>
    %135 = arith.addf %133, %134 : vector<2x64xf32>
    %136 = vector.extract_strided_slice %135 {offsets = [0, 0], sizes = [2, 16], strides = [1, 1]} : vector<2x64xf32> to vector<2x16xf32>
    %137 = arith.negf %136 : vector<2x16xf32>
    %138 = math.exp %137 : vector<2x16xf32>
    %cst_34 = arith.constant 1.000000e+00 : f32
    %139 = vector.broadcast %cst_34 : f32 to vector<2x16xf32>
    %140 = arith.addf %139, %138 : vector<2x16xf32>
    %141 = arith.divf %139, %140 : vector<2x16xf32>
    %142 = vector.extract_strided_slice %135 {offsets = [0, 16], sizes = [2, 16], strides = [1, 1]} : vector<2x64xf32> to vector<2x16xf32>
    %143 = arith.negf %142 : vector<2x16xf32>
    %144 = math.exp %143 : vector<2x16xf32>
    %cst_35 = arith.constant 1.000000e+00 : f32
    %145 = vector.broadcast %cst_35 : f32 to vector<2x16xf32>
    %146 = arith.addf %145, %144 : vector<2x16xf32>
    %147 = arith.divf %145, %146 : vector<2x16xf32>
    %148 = vector.extract_strided_slice %135 {offsets = [0, 32], sizes = [2, 16], strides = [1, 1]} : vector<2x64xf32> to vector<2x16xf32>
    %149 = math.tanh %148 : vector<2x16xf32>
    %150 = vector.extract_strided_slice %135 {offsets = [0, 48], sizes = [2, 16], strides = [1, 1]} : vector<2x64xf32> to vector<2x16xf32>
    %151 = arith.negf %150 : vector<2x16xf32>
    %152 = math.exp %151 : vector<2x16xf32>
    %cst_36 = arith.constant 1.000000e+00 : f32
    %153 = vector.broadcast %cst_36 : f32 to vector<2x16xf32>
    %154 = arith.addf %153, %152 : vector<2x16xf32>
    %155 = arith.divf %153, %154 : vector<2x16xf32>
    %156 = arith.mulf %147, %120 : vector<2x16xf32>
    %157 = arith.mulf %141, %149 : vector<2x16xf32>
    %158 = arith.addf %156, %157 : vector<2x16xf32>
    %159 = math.tanh %158 : vector<2x16xf32>
    %160 = arith.mulf %155, %159 : vector<2x16xf32>
    %c3_i32 = arith.constant 3 : i32
    %161 = vector.broadcast %c3_i32 : i32 to vector<2x1xi32>
    %162 = arith.cmpi eq, %11, %161 : vector<2x1xi32>
    %163 = vector.shape_cast %162 : vector<2x1xi1> to vector<2x1xi1>
    %164 = vector.broadcast %163 : vector<2x1xi1> to vector<2x16xi1>
    %165 = arith.select %164, %160, %127 : vector<2x16xi1>, vector<2x16xf32>
    %c3_i32_37 = arith.constant 3 : i32
    %166 = vector.broadcast %c3_i32_37 : i32 to vector<2x1xi32>
    %167 = arith.cmpi eq, %12, %166 : vector<2x1xi32>
    %168 = vector.shape_cast %167 : vector<2x1xi1> to vector<2x1xi1>
    %169 = vector.broadcast %168 : vector<2x1xi1> to vector<2x16xi1>
    %170 = arith.select %169, %160, %132 : vector<2x16xi1>, vector<2x16xf32>
    %171 = vector.extract_strided_slice %8 {offsets = [8, 0], sizes = [2, 64], strides = [1, 1]} : vector<16x64xf32> to vector<2x64xf32>
    %cst_38 = arith.constant dense<0.000000e+00> : vector<2x64xf32>
    %172 = tpu.matmul %160, %14, %cst_38 {dimension_numbers = #tpu.dot_dimension_numbers<[1], [0], [0], [1], [0, 0, 1, 1], [], []>} : vector<2x16xf32>, vector<16x64xf32>, vector<2x64xf32> -> vector<2x64xf32>
    %173 = arith.addf %171, %172 : vector<2x64xf32>
    %174 = vector.extract_strided_slice %173 {offsets = [0, 0], sizes = [2, 16], strides = [1, 1]} : vector<2x64xf32> to vector<2x16xf32>
    %175 = arith.negf %174 : vector<2x16xf32>
    %176 = math.exp %175 : vector<2x16xf32>
    %cst_39 = arith.constant 1.000000e+00 : f32
    %177 = vector.broadcast %cst_39 : f32 to vector<2x16xf32>
    %178 = arith.addf %177, %176 : vector<2x16xf32>
    %179 = arith.divf %177, %178 : vector<2x16xf32>
    %180 = vector.extract_strided_slice %173 {offsets = [0, 16], sizes = [2, 16], strides = [1, 1]} : vector<2x64xf32> to vector<2x16xf32>
    %181 = arith.negf %180 : vector<2x16xf32>
    %182 = math.exp %181 : vector<2x16xf32>
    %cst_40 = arith.constant 1.000000e+00 : f32
    %183 = vector.broadcast %cst_40 : f32 to vector<2x16xf32>
    %184 = arith.addf %183, %182 : vector<2x16xf32>
    %185 = arith.divf %183, %184 : vector<2x16xf32>
    %186 = vector.extract_strided_slice %173 {offsets = [0, 32], sizes = [2, 16], strides = [1, 1]} : vector<2x64xf32> to vector<2x16xf32>
    %187 = math.tanh %186 : vector<2x16xf32>
    %188 = vector.extract_strided_slice %173 {offsets = [0, 48], sizes = [2, 16], strides = [1, 1]} : vector<2x64xf32> to vector<2x16xf32>
    %189 = arith.negf %188 : vector<2x16xf32>
    %190 = math.exp %189 : vector<2x16xf32>
    %cst_41 = arith.constant 1.000000e+00 : f32
    %191 = vector.broadcast %cst_41 : f32 to vector<2x16xf32>
    %192 = arith.addf %191, %190 : vector<2x16xf32>
    %193 = arith.divf %191, %192 : vector<2x16xf32>
    %194 = arith.mulf %185, %158 : vector<2x16xf32>
    %195 = arith.mulf %179, %187 : vector<2x16xf32>
    %196 = arith.addf %194, %195 : vector<2x16xf32>
    %197 = math.tanh %196 : vector<2x16xf32>
    %198 = arith.mulf %193, %197 : vector<2x16xf32>
    %c4_i32 = arith.constant 4 : i32
    %199 = vector.broadcast %c4_i32 : i32 to vector<2x1xi32>
    %200 = arith.cmpi eq, %11, %199 : vector<2x1xi32>
    %201 = vector.shape_cast %200 : vector<2x1xi1> to vector<2x1xi1>
    %202 = vector.broadcast %201 : vector<2x1xi1> to vector<2x16xi1>
    %203 = arith.select %202, %198, %165 : vector<2x16xi1>, vector<2x16xf32>
    %c4_i32_42 = arith.constant 4 : i32
    %204 = vector.broadcast %c4_i32_42 : i32 to vector<2x1xi32>
    %205 = arith.cmpi eq, %12, %204 : vector<2x1xi32>
    %206 = vector.shape_cast %205 : vector<2x1xi1> to vector<2x1xi1>
    %207 = vector.broadcast %206 : vector<2x1xi1> to vector<2x16xi1>
    %208 = arith.select %207, %198, %170 : vector<2x16xi1>, vector<2x16xf32>
    %209 = vector.extract_strided_slice %8 {offsets = [10, 0], sizes = [2, 64], strides = [1, 1]} : vector<16x64xf32> to vector<2x64xf32>
    %cst_43 = arith.constant dense<0.000000e+00> : vector<2x64xf32>
    %210 = tpu.matmul %198, %14, %cst_43 {dimension_numbers = #tpu.dot_dimension_numbers<[1], [0], [0], [1], [0, 0, 1, 1], [], []>} : vector<2x16xf32>, vector<16x64xf32>, vector<2x64xf32> -> vector<2x64xf32>
    %211 = arith.addf %209, %210 : vector<2x64xf32>
    %212 = vector.extract_strided_slice %211 {offsets = [0, 0], sizes = [2, 16], strides = [1, 1]} : vector<2x64xf32> to vector<2x16xf32>
    %213 = arith.negf %212 : vector<2x16xf32>
    %214 = math.exp %213 : vector<2x16xf32>
    %cst_44 = arith.constant 1.000000e+00 : f32
    %215 = vector.broadcast %cst_44 : f32 to vector<2x16xf32>
    %216 = arith.addf %215, %214 : vector<2x16xf32>
    %217 = arith.divf %215, %216 : vector<2x16xf32>
    %218 = vector.extract_strided_slice %211 {offsets = [0, 16], sizes = [2, 16], strides = [1, 1]} : vector<2x64xf32> to vector<2x16xf32>
    %219 = arith.negf %218 : vector<2x16xf32>
    %220 = math.exp %219 : vector<2x16xf32>
    %cst_45 = arith.constant 1.000000e+00 : f32
    %221 = vector.broadcast %cst_45 : f32 to vector<2x16xf32>
    %222 = arith.addf %221, %220 : vector<2x16xf32>
    %223 = arith.divf %221, %222 : vector<2x16xf32>
    %224 = vector.extract_strided_slice %211 {offsets = [0, 32], sizes = [2, 16], strides = [1, 1]} : vector<2x64xf32> to vector<2x16xf32>
    %225 = math.tanh %224 : vector<2x16xf32>
    %226 = vector.extract_strided_slice %211 {offsets = [0, 48], sizes = [2, 16], strides = [1, 1]} : vector<2x64xf32> to vector<2x16xf32>
    %227 = arith.negf %226 : vector<2x16xf32>
    %228 = math.exp %227 : vector<2x16xf32>
    %cst_46 = arith.constant 1.000000e+00 : f32
    %229 = vector.broadcast %cst_46 : f32 to vector<2x16xf32>
    %230 = arith.addf %229, %228 : vector<2x16xf32>
    %231 = arith.divf %229, %230 : vector<2x16xf32>
    %232 = arith.mulf %223, %196 : vector<2x16xf32>
    %233 = arith.mulf %217, %225 : vector<2x16xf32>
    %234 = arith.addf %232, %233 : vector<2x16xf32>
    %235 = math.tanh %234 : vector<2x16xf32>
    %236 = arith.mulf %231, %235 : vector<2x16xf32>
    %c5_i32 = arith.constant 5 : i32
    %237 = vector.broadcast %c5_i32 : i32 to vector<2x1xi32>
    %238 = arith.cmpi eq, %11, %237 : vector<2x1xi32>
    %239 = vector.shape_cast %238 : vector<2x1xi1> to vector<2x1xi1>
    %240 = vector.broadcast %239 : vector<2x1xi1> to vector<2x16xi1>
    %241 = arith.select %240, %236, %203 : vector<2x16xi1>, vector<2x16xf32>
    %c5_i32_47 = arith.constant 5 : i32
    %242 = vector.broadcast %c5_i32_47 : i32 to vector<2x1xi32>
    %243 = arith.cmpi eq, %12, %242 : vector<2x1xi32>
    %244 = vector.shape_cast %243 : vector<2x1xi1> to vector<2x1xi1>
    %245 = vector.broadcast %244 : vector<2x1xi1> to vector<2x16xi1>
    %246 = arith.select %245, %236, %208 : vector<2x16xi1>, vector<2x16xf32>
    %247 = vector.extract_strided_slice %8 {offsets = [12, 0], sizes = [2, 64], strides = [1, 1]} : vector<16x64xf32> to vector<2x64xf32>
    %cst_48 = arith.constant dense<0.000000e+00> : vector<2x64xf32>
    %248 = tpu.matmul %236, %14, %cst_48 {dimension_numbers = #tpu.dot_dimension_numbers<[1], [0], [0], [1], [0, 0, 1, 1], [], []>} : vector<2x16xf32>, vector<16x64xf32>, vector<2x64xf32> -> vector<2x64xf32>
    %249 = arith.addf %247, %248 : vector<2x64xf32>
    %250 = vector.extract_strided_slice %249 {offsets = [0, 0], sizes = [2, 16], strides = [1, 1]} : vector<2x64xf32> to vector<2x16xf32>
    %251 = arith.negf %250 : vector<2x16xf32>
    %252 = math.exp %251 : vector<2x16xf32>
    %cst_49 = arith.constant 1.000000e+00 : f32
    %253 = vector.broadcast %cst_49 : f32 to vector<2x16xf32>
    %254 = arith.addf %253, %252 : vector<2x16xf32>
    %255 = arith.divf %253, %254 : vector<2x16xf32>
    %256 = vector.extract_strided_slice %249 {offsets = [0, 16], sizes = [2, 16], strides = [1, 1]} : vector<2x64xf32> to vector<2x16xf32>
    %257 = arith.negf %256 : vector<2x16xf32>
    %258 = math.exp %257 : vector<2x16xf32>
    %cst_50 = arith.constant 1.000000e+00 : f32
    %259 = vector.broadcast %cst_50 : f32 to vector<2x16xf32>
    %260 = arith.addf %259, %258 : vector<2x16xf32>
    %261 = arith.divf %259, %260 : vector<2x16xf32>
    %262 = vector.extract_strided_slice %249 {offsets = [0, 32], sizes = [2, 16], strides = [1, 1]} : vector<2x64xf32> to vector<2x16xf32>
    %263 = math.tanh %262 : vector<2x16xf32>
    %264 = vector.extract_strided_slice %249 {offsets = [0, 48], sizes = [2, 16], strides = [1, 1]} : vector<2x64xf32> to vector<2x16xf32>
    %265 = arith.negf %264 : vector<2x16xf32>
    %266 = math.exp %265 : vector<2x16xf32>
    %cst_51 = arith.constant 1.000000e+00 : f32
    %267 = vector.broadcast %cst_51 : f32 to vector<2x16xf32>
    %268 = arith.addf %267, %266 : vector<2x16xf32>
    %269 = arith.divf %267, %268 : vector<2x16xf32>
    %270 = arith.mulf %261, %234 : vector<2x16xf32>
    %271 = arith.mulf %255, %263 : vector<2x16xf32>
    %272 = arith.addf %270, %271 : vector<2x16xf32>
    %273 = math.tanh %272 : vector<2x16xf32>
    %274 = arith.mulf %269, %273 : vector<2x16xf32>
    %c6_i32 = arith.constant 6 : i32
    %275 = vector.broadcast %c6_i32 : i32 to vector<2x1xi32>
    %276 = arith.cmpi eq, %11, %275 : vector<2x1xi32>
    %277 = vector.shape_cast %276 : vector<2x1xi1> to vector<2x1xi1>
    %278 = vector.broadcast %277 : vector<2x1xi1> to vector<2x16xi1>
    %279 = arith.select %278, %274, %241 : vector<2x16xi1>, vector<2x16xf32>
    %c6_i32_52 = arith.constant 6 : i32
    %280 = vector.broadcast %c6_i32_52 : i32 to vector<2x1xi32>
    %281 = arith.cmpi eq, %12, %280 : vector<2x1xi32>
    %282 = vector.shape_cast %281 : vector<2x1xi1> to vector<2x1xi1>
    %283 = vector.broadcast %282 : vector<2x1xi1> to vector<2x16xi1>
    %284 = arith.select %283, %274, %246 : vector<2x16xi1>, vector<2x16xf32>
    %285 = vector.extract_strided_slice %8 {offsets = [14, 0], sizes = [2, 64], strides = [1, 1]} : vector<16x64xf32> to vector<2x64xf32>
    %cst_53 = arith.constant dense<0.000000e+00> : vector<2x64xf32>
    %286 = tpu.matmul %274, %14, %cst_53 {dimension_numbers = #tpu.dot_dimension_numbers<[1], [0], [0], [1], [0, 0, 1, 1], [], []>} : vector<2x16xf32>, vector<16x64xf32>, vector<2x64xf32> -> vector<2x64xf32>
    %287 = arith.addf %285, %286 : vector<2x64xf32>
    %288 = vector.extract_strided_slice %287 {offsets = [0, 0], sizes = [2, 16], strides = [1, 1]} : vector<2x64xf32> to vector<2x16xf32>
    %289 = arith.negf %288 : vector<2x16xf32>
    %290 = math.exp %289 : vector<2x16xf32>
    %cst_54 = arith.constant 1.000000e+00 : f32
    %291 = vector.broadcast %cst_54 : f32 to vector<2x16xf32>
    %292 = arith.addf %291, %290 : vector<2x16xf32>
    %293 = arith.divf %291, %292 : vector<2x16xf32>
    %294 = vector.extract_strided_slice %287 {offsets = [0, 16], sizes = [2, 16], strides = [1, 1]} : vector<2x64xf32> to vector<2x16xf32>
    %295 = arith.negf %294 : vector<2x16xf32>
    %296 = math.exp %295 : vector<2x16xf32>
    %cst_55 = arith.constant 1.000000e+00 : f32
    %297 = vector.broadcast %cst_55 : f32 to vector<2x16xf32>
    %298 = arith.addf %297, %296 : vector<2x16xf32>
    %299 = arith.divf %297, %298 : vector<2x16xf32>
    %300 = vector.extract_strided_slice %287 {offsets = [0, 32], sizes = [2, 16], strides = [1, 1]} : vector<2x64xf32> to vector<2x16xf32>
    %301 = math.tanh %300 : vector<2x16xf32>
    %302 = vector.extract_strided_slice %287 {offsets = [0, 48], sizes = [2, 16], strides = [1, 1]} : vector<2x64xf32> to vector<2x16xf32>
    %303 = arith.negf %302 : vector<2x16xf32>
    %304 = math.exp %303 : vector<2x16xf32>
    %cst_56 = arith.constant 1.000000e+00 : f32
    %305 = vector.broadcast %cst_56 : f32 to vector<2x16xf32>
    %306 = arith.addf %305, %304 : vector<2x16xf32>
    %307 = arith.divf %305, %306 : vector<2x16xf32>
    %308 = arith.mulf %299, %272 : vector<2x16xf32>
    %309 = arith.mulf %293, %301 : vector<2x16xf32>
    %310 = arith.addf %308, %309 : vector<2x16xf32>
    %311 = math.tanh %310 : vector<2x16xf32>
    %312 = arith.mulf %307, %311 : vector<2x16xf32>
    %c7_i32 = arith.constant 7 : i32
    %313 = vector.broadcast %c7_i32 : i32 to vector<2x1xi32>
    %314 = arith.cmpi eq, %11, %313 : vector<2x1xi32>
    %315 = vector.shape_cast %314 : vector<2x1xi1> to vector<2x1xi1>
    %316 = vector.broadcast %315 : vector<2x1xi1> to vector<2x16xi1>
    %317 = arith.select %316, %312, %279 : vector<2x16xi1>, vector<2x16xf32>
    %c7_i32_57 = arith.constant 7 : i32
    %318 = vector.broadcast %c7_i32_57 : i32 to vector<2x1xi32>
    %319 = arith.cmpi eq, %12, %318 : vector<2x1xi32>
    %320 = vector.shape_cast %319 : vector<2x1xi1> to vector<2x1xi1>
    %321 = vector.broadcast %320 : vector<2x1xi1> to vector<2x16xi1>
    %322 = arith.select %321, %312, %284 : vector<2x16xi1>, vector<2x16xf32>
    %c0_58 = arith.constant 0 : index
    %c0_59 = arith.constant 0 : index
    %c0_60 = arith.constant 0 : index
    %c0_61 = arith.constant 0 : index
    %323 = vector.load %arg6[%c0_58, %c0_59, %c0_60, %c0_61] : memref<1x2x2x16xf32, #tpu.memory_space<vmem>>, vector<1x1x2x16xf32>
    %324 = vector.shape_cast %323 : vector<1x1x2x16xf32> to vector<2x16xf32>
    %325 = vector.shape_cast %317 : vector<2x16xf32> to vector<1x1x2x16xf32>
    tpu.vector_store %arg6[%c0_58, %c0_59, %c0_60, %c0_61], %325 {strides = array<i32>} : memref<1x2x2x16xf32, #tpu.memory_space<vmem>>, vector<1x1x2x16xf32>,
    %c0_62 = arith.constant 0 : index
    %c1 = arith.constant 1 : index
    %c0_63 = arith.constant 0 : index
    %c0_64 = arith.constant 0 : index
    %326 = vector.load %arg6[%c0_62, %c1, %c0_63, %c0_64] : memref<1x2x2x16xf32, #tpu.memory_space<vmem>>, vector<1x1x2x16xf32>
    %327 = vector.shape_cast %326 : vector<1x1x2x16xf32> to vector<2x16xf32>
    %328 = vector.shape_cast %322 : vector<2x16xf32> to vector<1x1x2x16xf32>
    tpu.vector_store %arg6[%c0_62, %c1, %c0_63, %c0_64], %328 {strides = array<i32>} : memref<1x2x2x16xf32, #tpu.memory_space<vmem>>, vector<1x1x2x16xf32>,
    return
  }
  func.func @transform_0(%arg0: i32) -> (i32, i32, i32) {
    %c0_i32 = arith.constant 0 : i32
    %c0_i32_0 = arith.constant 0 : i32
    %c0_i32_1 = arith.constant 0 : i32
    return %arg0, %c0_i32, %c0_i32_0 : i32, i32, i32
  }
  func.func @transform_1(%arg0: i32) -> (i32, i32, i32) {
    %c0_i32 = arith.constant 0 : i32
    %c0_i32_0 = arith.constant 0 : i32
    %c0_i32_1 = arith.constant 0 : i32
    return %arg0, %c0_i32, %c0_i32_0 : i32, i32, i32
  }
  func.func @transform_2(%arg0: i32) -> (i32, i32, i32) {
    %c0_i32 = arith.constant 0 : i32
    %c0_i32_0 = arith.constant 0 : i32
    %c0_i32_1 = arith.constant 0 : i32
    return %arg0, %c0_i32, %c0_i32_0 : i32, i32, i32
  }
  func.func @transform_3(%arg0: i32) -> (i32, i32, i32) {
    %c0_i32 = arith.constant 0 : i32
    %c0_i32_0 = arith.constant 0 : i32
    %c0_i32_1 = arith.constant 0 : i32
    return %arg0, %c0_i32, %c0_i32_0 : i32, i32, i32
  }
  func.func @transform_4(%arg0: i32) -> (i32, i32, i32) {
    %c0_i32 = arith.constant 0 : i32
    %c0_i32_0 = arith.constant 0 : i32
    %c0_i32_1 = arith.constant 0 : i32
    return %arg0, %c0_i32, %c0_i32_0 : i32, i32, i32
  }
  func.func @transform_5(%arg0: i32) -> (i32, i32, i32, i32) {
    %c0_i32 = arith.constant 0 : i32
    %c0_i32_0 = arith.constant 0 : i32
    %c0_i32_1 = arith.constant 0 : i32
    %c0_i32_2 = arith.constant 0 : i32
    return %arg0, %c0_i32, %c0_i32_0, %c0_i32_1 : i32, i32, i32, i32
  }
}

</mosaic_0001>

<bundles_post_ra>
// kernel: sim_predictor_forward.4
= control target key start
LH: loop header
LB: loop body
LE: loop exit
PB: predicated region body
PF: predicated region fallthrough
CT: control target
= control target key end

     0   :  { %v702_v3 = vmov 0   ;;  %vm152_vm0 = vcmask 588800   ;;  %s1245_s0 = inlined_call_operand.vmem [shape: f32[200,512], index: 0, kind: input, shape index: {}]   ;;  %s1246_s1 = inlined_call_operand.vmem [shape: f32[32,200], index: 1, kind: input, shape index: {}]   ;;  %s1247_s2 = inlined_call_operand.vmem [shape: f32[32,1], index: 2, kind: input, shape index: {}]   ;;  %s1248_s3 = inlined_call_operand.vmem [shape: f32[32,1], index: 3, kind: input, shape index: {}]   ;;  %s1249_s4 = inlined_call_operand.vmem [shape: f32[32,1], index: 4, kind: input, shape index: {}]   ;;  %s1250_s5 = inlined_call_operand.vmem [shape: f32[32,512], index: 5, kind: output, shape index: {}]  }
   0x1   :  { %v29_v0 = vld [vmem:[%s1245_s0 + $0x8] sm:$0xff]  ;;  %v31_v2 = vld [vmem:[%s1245_s0 + $0x18] sm:$0xff]  ;;  %660 = vset.pattern.permute.xlu0 %v702_v3  ;;  %661 = vset.pattern.permute.xlu1 %v702_v3  ;;  %v28_v6 = vld [vmem:[%s1245_s0] sm:$0xff] }
   0x2   :  { %v33_v1 = vld [vmem:[%s1245_s0 + $0x28] sm:$0xff]  ;;  %v35_v5 = vld [vmem:[%s1245_s0 + $0x38] sm:$0xff]  ;;  %v32_v7 = vld [vmem:[%s1245_s0 + $0x20] sm:$0xff] }
   0x3   :  { %v563_v4 = vpack.c.bf16 %v33_v1, %v29_v0  ;;  %v611_v8 = vpack.c.bf16 %v35_v5, %v31_v2  ;;  %v565_v9 = vpack.c.bf16 %v32_v7, %v28_v6  ;;  %v30_v10 = vld [vmem:[%s1245_s0 + $0x10] sm:$0xff]  ;;  %v37_v12 = vld [vmem:[%s1245_s0 + $0x48] sm:$0xff]  ;;  %v39_v15 = vld [vmem:[%s1245_s0 + $0x58] sm:$0xff] }
   0x4   :  { %v34_v11 = vld [vmem:[%s1245_s0 + $0x30] sm:$0xff]  ;;  %v41_v14 = vld [vmem:[%s1245_s0 + $0x68] sm:$0xff]  ;;  %v43_v16 = vld [vmem:[%s1245_s0 + $0x78] sm:$0xff] }
   0x5   :  { %564 = vmatprep.subr.bf16.mxu0 %v563_v4  ;;  %v613_v13 = vpack.c.bf16 %v34_v11, %v30_v10  ;;  %612 = vmatprep.subr.bf16.mxu1 %v611_v8  ;;  %v567_v17 = vpack.c.bf16 %v41_v14, %v37_v12  ;;  %v615_v18 = vpack.c.bf16 %v43_v16, %v39_v15  ;;  %v36_v19 = vld [vmem:[%s1245_s0 + $0x40] sm:$0xff]  ;;  %v38_v21 = vld [vmem:[%s1245_s0 + $0x50] sm:$0xff]  ;;  %v45_v24 = vld [vmem:[%s1245_s0 + $0x88] sm:$0xff] }
   0x6   :  { %566 = vmatpush1.bf16.msra.mxu0 %v565_v9  ;;  %v40_v20 = vld [vmem:[%s1245_s0 + $0x60] sm:$0xff]  ;;  %v42_v23 = vld [vmem:[%s1245_s0 + $0x70] sm:$0xff]  ;;  %v49_v25 = vld [vmem:[%s1245_s0 + $0xa8] sm:$0xff] }
   0x7   :  { %614 = vmatpush1.bf16.msra.mxu1 %v613_v13  ;;  %v569_v22 = vpack.c.bf16 %v40_v20, %v36_v19  ;;  %568 = vmatprep.subr.bf16.mxu0 %v567_v17  ;;  %v617_v26 = vpack.c.bf16 %v42_v23, %v38_v21  ;;  %v571_v27 = vpack.c.bf16 %v49_v25, %v45_v24  ;;  %v47_v28 = vld [vmem:[%s1245_s0 + $0x98] sm:$0xff]  ;;  %v44_v30 = vld [vmem:[%s1245_s0 + $0x80] sm:$0xff]  ;;  %v46_v33 = vld [vmem:[%s1245_s0 + $0x90] sm:$0xff] }
   0x8   :  { %616 = vmatprep.subr.bf16.mxu1 %v615_v18  ;;  %v51_v29 = vld [vmem:[%s1245_s0 + $0xb8] sm:$0xff]  ;;  %v48_v32 = vld [vmem:[%s1245_s0 + $0xa0] sm:$0xff]  ;;  %v50_v34 = vld [vmem:[%s1245_s0 + $0xb0] sm:$0xff] }
   0x9   :  { %v619_v31 = vpack.c.bf16 %v51_v29, %v47_v28  ;;  %v573_v35 = vpack.c.bf16 %v48_v32, %v44_v30  ;;  %v53_v36 = vld [vmem:[%s1245_s0 + $0xc8] sm:$0xff]  ;;  %v55_v38 = vld [vmem:[%s1245_s0 + $0xd8] sm:$0xff]  ;;  %v621_v39 = vpack.c.bf16 %v50_v34, %v46_v33  ;;  %v52_v42 = vld [vmem:[%s1245_s0 + $0xc0] sm:$0xff] }
   0xa   :  { %570 = vmatpush1.bf16.msra.mxu0 %v569_v22  ;;  %v57_v37 = vld [vmem:[%s1245_s0 + $0xe8] sm:$0xff]  ;;  %v59_v41 = vld [vmem:[%s1245_s0 + $0xf8] sm:$0xff]  ;;  %v56_v43 = vld [vmem:[%s1245_s0 + $0xe0] sm:$0xff] }
   0xb   :  { %618 = vmatpush1.bf16.msra.mxu1 %v617_v26  ;;  %572 = vmatprep.subr.bf16.mxu0 %v571_v27  ;;  %v575_v40 = vpack.c.bf16 %v57_v37, %v53_v36  ;;  %v623_v44 = vpack.c.bf16 %v59_v41, %v55_v38  ;;  %v54_v45 = vld [vmem:[%s1245_s0 + $0xd0] sm:$0xff]  ;;  %v61_v47 = vld [vmem:[%s1245_s0 + $0x108] sm:$0xff]  ;;  %v63_v49 = vld [vmem:[%s1245_s0 + $0x118] sm:$0xff]  ;;  %v577_v51 = vpack.c.bf16 %v56_v43, %v52_v42 }
   0xc   :  { %620 = vmatprep.subr.bf16.mxu1 %v619_v31  ;;  %v58_v46 = vld [vmem:[%s1245_s0 + $0xf0] sm:$0xff]  ;;  %v65_v48 = vld [vmem:[%s1245_s0 + $0x128] sm:$0xff]  ;;  %v67_v50 = vld [vmem:[%s1245_s0 + $0x138] sm:$0xff] }
   0xd   :  { %v625_v52 = vpack.c.bf16 %v58_v46, %v54_v45  ;;  %v579_v53 = vpack.c.bf16 %v65_v48, %v61_v47  ;;  %v60_v54 = vld [vmem:[%s1245_s0 + $0x100] sm:$0xff]  ;;  %v62_v56 = vld [vmem:[%s1245_s0 + $0x110] sm:$0xff]  ;;  %v627_v57 = vpack.c.bf16 %v67_v50, %v63_v49  ;;  %v69_v59 = vld [vmem:[%s1245_s0 + $0x148] sm:$0xff] }
   0xe   :  { %574 = vmatpush1.bf16.msra.mxu0 %v573_v35  ;;  %v64_v55 = vld [vmem:[%s1245_s0 + $0x120] sm:$0xff]  ;;  %v66_v58 = vld [vmem:[%s1245_s0 + $0x130] sm:$0xff]  ;;  %v73_v60 = vld [vmem:[%s1245_s0 + $0x168] sm:$0xff] }
   0xf   :  { %622 = vmatpush1.bf16.msra.mxu1 %v621_v39  ;;  %576 = vmatprep.subr.bf16.mxu0 %v575_v40  ;;  %v71_v61 = vld [vmem:[%s1245_s0 + $0x158] sm:$0xff]  ;;  %v581_v63 = vpack.c.bf16 %v64_v55, %v60_v54  ;;  %v629_v0 = vpack.c.bf16 %v66_v58, %v62_v56  ;;  %v583_v1 = vpack.c.bf16 %v73_v60, %v69_v59  ;;  %v68_v2 = vld [vmem:[%s1245_s0 + $0x140] sm:$0xff]  ;;  %v70_v4 = vld [vmem:[%s1245_s0 + $0x150] sm:$0xff] }
  0x10   :  { %624 = vmatprep.subr.bf16.mxu1 %v623_v44  ;;  %v75_v62 = vld [vmem:[%s1245_s0 + $0x178] sm:$0xff]  ;;  %v72_v3 = vld [vmem:[%s1245_s0 + $0x160] sm:$0xff]  ;;  %v74_v6 = vld [vmem:[%s1245_s0 + $0x170] sm:$0xff] }
  0x11   :  { %v631_v5 = vpack.c.bf16 %v75_v62, %v71_v61  ;;  %v77_v7 = vld [vmem:[%s1245_s0 + $0x188] sm:$0xff]  ;;  %v79_v9 = vld [vmem:[%s1245_s0 + $0x198] sm:$0xff]  ;;  %v585_v11 = vpack.c.bf16 %v72_v3, %v68_v2  ;;  %v633_v12 = vpack.c.bf16 %v74_v6, %v70_v4  ;;  %v76_v14 = vld [vmem:[%s1245_s0 + $0x180] sm:$0xff] }
  0x12   :  { %578 = vmatpush1.bf16.msra.mxu0 %v577_v51  ;;  %v81_v8 = vld [vmem:[%s1245_s0 + $0x1a8] sm:$0xff]  ;;  %v83_v10 = vld [vmem:[%s1245_s0 + $0x1b8] sm:$0xff]  ;;  %v80_v15 = vld [vmem:[%s1245_s0 + $0x1a0] sm:$0xff] }
  0x13   :  { %626 = vmatpush1.bf16.msra.mxu1 %v625_v52  ;;  %580 = vmatprep.subr.bf16.mxu0 %v579_v53  ;;  %v587_v13 = vpack.c.bf16 %v81_v8, %v77_v7  ;;  %v78_v16 = vld [vmem:[%s1245_s0 + $0x190] sm:$0xff]  ;;  %v635_v17 = vpack.c.bf16 %v83_v10, %v79_v9  ;;  %v85_v19 = vld [vmem:[%s1245_s0 + $0x1c8] sm:$0xff]  ;;  %v87_v21 = vld [vmem:[%s1245_s0 + $0x1d8] sm:$0xff]  ;;  %v589_v23 = vpack.c.bf16 %v80_v15, %v76_v14 }
  0x14   :  { %628 = vmatprep.subr.bf16.mxu1 %v627_v57  ;;  %v82_v18 = vld [vmem:[%s1245_s0 + $0x1b0] sm:$0xff]  ;;  %v89_v20 = vld [vmem:[%s1245_s0 + $0x1e8] sm:$0xff]  ;;  %v91_v22 = vld [vmem:[%s1245_s0 + $0x1f8] sm:$0xff] }
  0x15   :  { %v637_v24 = vpack.c.bf16 %v82_v18, %v78_v16  ;;  %v591_v25 = vpack.c.bf16 %v89_v20, %v85_v19  ;;  %v84_v26 = vld [vmem:[%s1245_s0 + $0x1c0] sm:$0xff]  ;;  %v86_v28 = vld [vmem:[%s1245_s0 + $0x1d0] sm:$0xff]  ;;  %v639_v29 = vpack.c.bf16 %v91_v22, %v87_v21  ;;  %v93_v31 = vld [vmem:[%s1245_s0 + $0x208] sm:$0xff] }
  0x16   :  { %582 = vmatpush1.bf16.msra.mxu0 %v581_v63  ;;  %v88_v27 = vld [vmem:[%s1245_s0 + $0x1e0] sm:$0xff]  ;;  %v90_v30 = vld [vmem:[%s1245_s0 + $0x1f0] sm:$0xff]  ;;  %v97_v32 = vld [vmem:[%s1245_s0 + $0x228] sm:$0xff] }
  0x17   :  { %630 = vmatpush1.bf16.msra.mxu1 %v629_v0  ;;  %584 = vmatprep.subr.bf16.mxu0 %v583_v1  ;;  %v95_v33 = vld [vmem:[%s1245_s0 + $0x218] sm:$0xff]  ;;  %v593_v35 = vpack.c.bf16 %v88_v27, %v84_v26  ;;  %v641_v36 = vpack.c.bf16 %v90_v30, %v86_v28  ;;  %v595_v37 = vpack.c.bf16 %v97_v32, %v93_v31  ;;  %v92_v38 = vld [vmem:[%s1245_s0 + $0x200] sm:$0xff]  ;;  %v94_v40 = vld [vmem:[%s1245_s0 + $0x210] sm:$0xff] }
  0x18   :  { %632 = vmatprep.subr.bf16.mxu1 %v631_v5  ;;  %v99_v34 = vld [vmem:[%s1245_s0 + $0x238] sm:$0xff]  ;;  %v96_v39 = vld [vmem:[%s1245_s0 + $0x220] sm:$0xff]  ;;  %v98_v42 = vld [vmem:[%s1245_s0 + $0x230] sm:$0xff] }
  0x19   :  { %v643_v41 = vpack.c.bf16 %v99_v34, %v95_v33  ;;  %v101_v43 = vld [vmem:[%s1245_s0 + $0x248] sm:$0xff]  ;;  %v103_v45 = vld [vmem:[%s1245_s0 + $0x258] sm:$0xff]  ;;  %v597_v47 = vpack.c.bf16 %v96_v39, %v92_v38  ;;  %v100_v48 = vld [vmem:[%s1245_s0 + $0x240] sm:$0xff]  ;;  %v645_v49 = vpack.c.bf16 %v98_v42, %v94_v40 }
  0x1a   :  { %586 = vmatpush1.bf16.msra.mxu0 %v585_v11  ;;  %v105_v44 = vld [vmem:[%s1245_s0 + $0x268] sm:$0xff]  ;;  %v107_v46 = vld [vmem:[%s1245_s0 + $0x278] sm:$0xff]  ;;  %v104_v51 = vld [vmem:[%s1245_s0 + $0x260] sm:$0xff] }
  0x1b   :  { %634 = vmatpush1.bf16.msra.mxu1 %v633_v12  ;;  %588 = vmatprep.subr.bf16.mxu0 %v587_v13  ;;  %v599_v50 = vpack.c.bf16 %v105_v44, %v101_v43  ;;  %v102_v52 = vld [vmem:[%s1245_s0 + $0x250] sm:$0xff]  ;;  %v21_v53 = vld [vmem:[%s1246_s1 + $0x8] sm:$0xff]  ;;  %v647_v54 = vpack.c.bf16 %v107_v46, %v103_v45  ;;  %v111_v58 = vld [vmem:[%s1245_s0 + $0x298] sm:$0xff]  ;;  %v601_v60 = vpack.c.bf16 %v104_v51, %v100_v48 }
  0x1c   :  { %636 = vmatprep.subr.bf16.mxu1 %v635_v17  ;;  %v106_v55 = vld [vmem:[%s1245_s0 + $0x270] sm:$0xff]  ;;  %v109_v56 = vld [vmem:[%s1245_s0 + $0x288] sm:$0xff]  ;;  %555 = vmatprep.mubr.msk.f32.mxu0 %vm152_vm0, %v21_v53  ;;  %v115_v59 = vld [vmem:[%s1245_s0 + $0x2b8] sm:$0xff] }
  0x1d   :  { %v113_v57 = vld [vmem:[%s1245_s0 + $0x2a8] sm:$0xff]  ;;  %559 = vmatprep.mubr.msk.f32.mxu1 %vm152_vm0, %v21_v53  ;;  %v128_v61 = vld [vmem:[%s1247_s2] sm:$0xff]  ;;  %v130_v62 = vld [vmem:[%s1247_s2 + $0x10] sm:$0xff]  ;;  %v649_v63 = vpack.c.bf16 %v106_v55, %v102_v52  ;;  %v651_v4 = vpack.c.bf16 %v115_v59, %v111_v58 }
  0x1e   :  { %590 = vmatpush1.bf16.msra.mxu0 %v589_v23  ;;  %v603_v0 = vpack.c.bf16 %v113_v57, %v109_v56  ;;  %v108_v1 = vld [vmem:[%s1245_s0 + $0x280] sm:$0xff]  ;;  %v110_v3 = vld [vmem:[%s1245_s0 + $0x290] sm:$0xff]  ;;  %v117_v6 = vld [vmem:[%s1245_s0 + $0x2c8] sm:$0xff]  ;;  %134 = vperm.xlu0 %660, %v128_v61  }
  0x1f   :  { %638 = vmatpush1.bf16.msra.mxu1 %v637_v24  ;;  %592 = vmatprep.subr.bf16.mxu0 %v591_v25  ;;  %v112_v2 = vld [vmem:[%s1245_s0 + $0x2a0] sm:$0xff]  ;;  %v114_v5 = vld [vmem:[%s1245_s0 + $0x2b0] sm:$0xff]  ;;  %v121_v7 = vld [vmem:[%s1245_s0 + $0x2e8] sm:$0xff] }
  0x20   :  { %640 = vmatprep.subr.bf16.mxu1 %v639_v29  ;;  %v119_v8 = vld [vmem:[%s1245_s0 + $0x2d8] sm:$0xff]  ;;  %v129_v10 = vld [vmem:[%s1247_s2 + $0x8] sm:$0xff]  ;;  %144 = vperm.xlu1 %661, %v130_v62   ;;  %v605_v11 = vpack.c.bf16 %v112_v2, %v108_v1  ;;  %v653_v13 = vpack.c.bf16 %v114_v5, %v110_v3  ;;  %v607_v14 = vpack.c.bf16 %v121_v7, %v117_v6  ;;  %v116_v15 = vld [vmem:[%s1245_s0 + $0x2c0] sm:$0xff] }
  0x21   :  { %v123_v9 = vld [vmem:[%s1245_s0 + $0x2f8] sm:$0xff]  ;;  %v120_v16 = vld [vmem:[%s1245_s0 + $0x2e0] sm:$0xff]  ;;  %v118_v18 = vld [vmem:[%s1245_s0 + $0x2d0] sm:$0xff] }
  0x22   :  { %594 = vmatpush1.bf16.msra.mxu0 %v593_v35  ;;  %v131_v12 = vld [vmem:[%s1247_s2 + $0x18] sm:$0xff]  ;;  %v655_v17 = vpack.c.bf16 %v123_v9, %v119_v8  ;;  %v122_v19 = vld [vmem:[%s1245_s0 + $0x2f0] sm:$0xff]  ;;  %139 = vperm.xlu0 %660, %v129_v10   ;;  %v609_v20 = vpack.c.bf16 %v120_v16, %v116_v15  ;;  %v125_v22 = vld [vmem:[%s1245_s0 + $0x308] sm:$0xff] }
  0x23   :  { %642 = vmatpush1.bf16.msra.mxu1 %v641_v36  ;;  %596 = vmatprep.subr.bf16.mxu0 %v595_v37  ;;  %v657_v21 = vpack.c.bf16 %v122_v19, %v118_v18  ;;  %v127_v23 = vld [vmem:[%s1245_s0 + $0x318] sm:$0xff]  ;;  %v124_v24 = vld [vmem:[%s1245_s0 + $0x300] sm:$0xff]  ;;  %v126_v25 = vld [vmem:[%s1245_s0 + $0x310] sm:$0xff] }
  0x24   :  { %644 = vmatprep.subr.bf16.mxu1 %v643_v41  ;;  %149 = vperm.xlu1 %661, %v131_v12   ;;  %v20_v26 = vld [vmem:[%s1246_s1] sm:$0xff]  ;;  %v23_v27 = vld [vmem:[%s1246_s1 + $0x18] sm:$0xff]  ;;  %v22_v28 = vld [vmem:[%s1246_s1 + $0x10] sm:$0xff] }
  0x25   :  { %v25_v29 = vld [vmem:[%s1246_s1 + $0x28] sm:$0xff]  ;;  %v24_v30 = vld [vmem:[%s1246_s1 + $0x20] sm:$0xff]  ;;  %v27_v31 = vld [vmem:[%s1246_s1 + $0x38] sm:$0xff] }
  0x26   :  { %598 = vmatpush1.bf16.msra.mxu0 %v597_v47  ;;  %v26_v32 = vld [vmem:[%s1246_s1 + $0x30] sm:$0xff] }
  0x27   :  { %646 = vmatpush1.bf16.msra.mxu1 %v645_v49  ;;  %600 = vmatprep.subr.bf16.mxu0 %v599_v50 }
  0x28   :  { %648 = vmatprep.subr.bf16.mxu1 %v647_v54 }
  0x2a   :  { %602 = vmatpush1.bf16.msra.mxu0 %v601_v60 }
  0x2b   :  { %650 = vmatpush1.bf16.msra.mxu1 %v649_v63  ;;  %604 = vmatprep.subr.bf16.mxu0 %v603_v0 }
  0x2c   :  { %652 = vmatprep.subr.bf16.mxu1 %v651_v4 }
  0x2e   :  { %606 = vmatpush1.bf16.msra.mxu0 %v605_v11 }
  0x2f   :  { %654 = vmatpush1.bf16.msra.mxu1 %v653_v13  ;;  %608 = vmatprep.subr.bf16.mxu0 %v607_v14 }
  0x30   :  { %656 = vmatprep.subr.bf16.mxu1 %v655_v17 }
  0x32   :  { %610 = vmatpush1.bf16.msra.mxu0 %v609_v20 }
  0x33   :  { %658 = vmatpush1.bf16.msra.mxu1 %v657_v21  ;;  %213 = vmatprep.subr.mxu0 %v125_v22 }
  0x34   :  { %302 = vmatprep.subr.mxu1 %v127_v23 }
  0x36   :  { %214 = vmatpush1.msra.mxu0 %v124_v24 }
  0x37   :  { %303 = vmatpush1.msra.mxu1 %v126_v25  ;;  %230 = vmatmul.mubr.f32.vlgmr.msra.gmra.mrb[0].mxu0 %v20_v26 }
  0x38   :  { %319 = vmatmul.mubr.f32.vlgmr.msra.gmra.mrb[0].mxu1 %v20_v26  ;;  %556 = vmatprep.mubr.msk.f32.mxu0 %vm152_vm0, %v23_v27 }
  0x39   :  { %560 = vmatprep.mubr.msk.f32.mxu1 %vm152_vm0, %v23_v27 }
  0x3b   :  { %236 = vmatmul.mubr.f32.gmra.mrb[2].mxu0 %v22_v28 }
  0x3c   :  { %325 = vmatmul.mubr.f32.gmra.mrb[2].mxu1 %v22_v28  ;;  %557 = vmatprep.mubr.msk.f32.mxu0 %vm152_vm0, %v25_v29 }
  0x3d   :  { %561 = vmatprep.mubr.msk.f32.mxu1 %vm152_vm0, %v25_v29 }
  0x3f   :  { %242 = vmatmul.mubr.f32.gmra.mrb[4].mxu0 %v24_v30 }
  0x40   :  { %331 = vmatmul.mubr.f32.gmra.mrb[4].mxu1 %v24_v30  ;;  %558 = vmatprep.mubr.msk.f32.mxu0 %vm152_vm0, %v27_v31 }
  0x41   :  { %562 = vmatprep.mubr.msk.f32.mxu1 %vm152_vm0, %v27_v31 }
  0x43   :  { %248 = vmatmul.mubr.f32.gmra.mrb[6].mxu0 %v26_v32 }
  0x44   :  { %337 = vmatmul.mubr.f32.gmra.mrb[6].mxu1 %v26_v32 }
  0x9d   :  { %v135_v33 = vpop.permute.xlu0 %134 }
  0x9f   :  { %v145_v42 = vpop.permute.xlu1 %144 }
  0xa1   :  { %v140_v43 = vpop.permute.xlu0 %139 }
  0xa3   :  { %v150_v6 = vpop.permute.xlu1 %149 }
 0x10a   :  { %v231_v34 = vpop.f32.mrb[0].mxu0 }
 0x10b   :  { %v1077_v35 = vadd.f32 %v231_v34, %v135_v33  ;;  %v320_v36 = vpop.f32.mrb[0].mxu1  ;;  %v233_v37 = vpop.f32.mrb[1].mxu0 }
 0x10c   :  { %v1079_v38 = vadd.f32 %v233_v37, %v135_v33  ;;  %v322_v39 = vpop.f32.mrb[1].mxu1  ;;  %v1083_v41 = vadd.f32 %v320_v36, %v135_v33 }
 0x10d   :  { %v367_v40 = vmul.f32 %v1077_v35, %v1077_v35  ;;  %v1089_v47 = vadd.f32 %v322_v39, %v135_v33 }
 0x10e   :  { %v343_v44 = vadd.f32 %v1079_v38, %v1077_v35  ;;  %v368_v45 = vmul.f32 %v1079_v38, %v1079_v38  ;;  %v237_v46 = vpop.f32.mrb[2].mxu0  ;;  %v369_v55 = vmul.f32 %v1083_v41, %v1083_v41 }
 0x10f   :  { %v1091_v48 = vadd.f32 %v237_v46, %v140_v43  ;;  %v326_v49 = vpop.f32.mrb[2].mxu1  ;;  %v239_v50 = vpop.f32.mrb[3].mxu0  ;;  %v370_v2 = vmul.f32 %v1089_v47, %v1089_v47 }
 0x110   :  { %v1093_v51 = vadd.f32 %v239_v50, %v140_v43  ;;  %v328_v52 = vpop.f32.mrb[3].mxu1  ;;  %v344_v53 = vadd.f32 %v343_v44, %v1083_v41  ;;  %v383_v54 = vadd.f32 %v368_v45, %v367_v40  ;;  %v1100_v57 = vadd.f32 %v326_v49, %v140_v43 }
 0x111   :  { %v371_v56 = vmul.f32 %v1091_v48, %v1091_v48  ;;  %v1107_v62 = vadd.f32 %v328_v52, %v140_v43 }
 0x112   :  { %v348_v58 = vadd.f32 %v1093_v51, %v1091_v48  ;;  %v372_v59 = vmul.f32 %v1093_v51, %v1093_v51  ;;  %v243_v60 = vpop.f32.mrb[4].mxu0  ;;  %v345_v61 = vadd.f32 %v344_v53, %v1089_v47  ;;  %v384_v3 = vadd.f32 %v383_v54, %v369_v55 }
 0x113   :  { %v1109_v63 = vadd.f32 %v243_v60, %v145_v42  ;;  %v245_v0 = vpop.f32.mrb[5].mxu0  ;;  %v332_v1 = vpop.f32.mrb[4].mxu1  ;;  %v373_v9 = vmul.f32 %v1100_v57, %v1100_v57  ;;  %v374_v21 = vmul.f32 %v1107_v62, %v1107_v62 }
 0x114   :  { %v1113_v4 = vadd.f32 %v245_v0, %v145_v42  ;;  %v1115_v5 = vadd.f32 %v332_v1, %v145_v42  ;;  %346 = vadd.xlane.f32.xlu0 %v345_v61  ;;  %v334_v7 = vpop.f32.mrb[5].mxu1  ;;  %v388_v8 = vadd.f32 %v372_v59, %v371_v56  ;;  %v385_v11 = vadd.f32 %v384_v3, %v370_v2 }
 0x115   :  { %v375_v10 = vmul.f32 %v1109_v63, %v1109_v63  ;;  %v349_v12 = vadd.f32 %v348_v58, %v1100_v57  ;;  %v1128_v16 = vadd.f32 %v334_v7, %v145_v42 }
 0x116   :  { %v353_v13 = vadd.f32 %v1113_v4, %v1109_v63  ;;  %v376_v14 = vmul.f32 %v1113_v4, %v1113_v4  ;;  %v377_v15 = vmul.f32 %v1115_v5, %v1115_v5  ;;  %v249_v17 = vpop.f32.mrb[6].mxu0  ;;  %386 = vadd.xlane.f32.xlu1 %v385_v11  ;;  %v389_v22 = vadd.f32 %v388_v8, %v373_v9 }
 0x117   :  { %v1130_v18 = vadd.f32 %v249_v17, %v150_v6  ;;  %v338_v19 = vpop.f32.mrb[6].mxu1  ;;  %v251_v20 = vpop.f32.mrb[7].mxu0  ;;  %v350_v27 = vadd.f32 %v349_v12, %v1107_v62  ;;  %v378_v32 = vmul.f32 %v1128_v16, %v1128_v16 }
 0x118   :  { %v1134_v23 = vadd.f32 %v251_v20, %v150_v6  ;;  %v340_v24 = vpop.f32.mrb[7].mxu1  ;;  %v393_v25 = vadd.f32 %v376_v14, %v375_v10  ;;  %v390_v28 = vadd.f32 %v389_v22, %v374_v21  ;;  %v354_v29 = vadd.f32 %v353_v13, %v1115_v5 }
 0x119   :  { %v379_v26 = vmul.f32 %v1130_v18, %v1130_v18  ;;  %v1146_v34 = vadd.f32 %v338_v19, %v150_v6  ;;  %v1152_v43 = vadd.f32 %v340_v24, %v150_v6  ;;  %v419_v24 = vld [vmem:[%s1248_s3] sm:$0xff] }
 0x11a   :  { %v358_v30 = vadd.f32 %v1134_v23, %v1130_v18  ;;  %v380_v31 = vmul.f32 %v1134_v23, %v1134_v23  ;;  %v394_v33 = vadd.f32 %v393_v25, %v377_v15  ;;  %351 = vadd.xlane.f32.xlu1 %v350_v27  ;;  %391 = vadd.xlane.f32.xlu0 %v390_v28 }
 0x11b   :  { %v355_v37 = vadd.f32 %v354_v29, %v1128_v16  ;;  %v381_v42 = vmul.f32 %v1146_v34, %v1146_v34  ;;  %v382_v46 = vmul.f32 %v1152_v43, %v1152_v43 }
 0x11c   :  { %v395_v36 = vadd.f32 %v394_v33, %v378_v32  ;;  %v359_v39 = vadd.f32 %v358_v30, %v1146_v34  ;;  %v398_v40 = vadd.f32 %v380_v31, %v379_v26  ;;  %v420_v30 = vld [vmem:[%s1248_s3 + $0x8] sm:$0xff] }
 0x11e   :  { %396 = vadd.xlane.f32.xlu1 %v395_v36  ;;  %356 = vadd.xlane.f32.xlu0 %v355_v37  ;;  %v360_v44 = vadd.f32 %v359_v39, %v1152_v43  ;;  %v399_v45 = vadd.f32 %v398_v40, %v381_v42  ;;  %v421_v36 = vld [vmem:[%s1248_s3 + $0x10] sm:$0xff]  ;;  %v435_v37 = vld [vmem:[%s1249_s4] sm:$0xff] }
 0x120   :  { %v400_v49 = vadd.f32 %v399_v45, %v382_v46  ;;  %v436_v45 = vld [vmem:[%s1249_s4 + $0x8] sm:$0xff]  ;;  %v437_v46 = vld [vmem:[%s1249_s4 + $0x10] sm:$0xff] }
 0x122   :  { %361 = vadd.xlane.f32.xlu0 %v360_v44 }
 0x126   :  { %401 = vadd.xlane.f32.xlu0 %v400_v49 }
 0x1a1   :  { %v347_v50 = vpop.xlane.xlu0 %346 }
 0x1a2   :  { %v363_v52 = vmul.f32 0.001953125, %v347_v50  ;;  %v422_v50 = vld [vmem:[%s1248_s3 + $0x18] sm:$0xff] }
 0x1a3   :  { %v387_v54 = vpop.xlane.xlu1 %386 }
 0x1a4   :  { %v407_v53 = vmul.f32 %v363_v52, %v363_v52  ;;  %v403_v55 = vmul.f32 0.001953125, %v387_v54 }
 0x1a6   :  { %v411_v56 = vsub.f32 %v403_v55, %v407_v53 }
 0x1a7   :  { %v352_v58 = vpop.xlane.xlu1 %351  ;;  %v392_v59 = vpop.xlane.xlu0 %391 }
 0x1a8   :  { %v415_v60 = vmax.f32 %v411_v56, 0.0  ;;  %v364_v61 = vmul.f32 0.001953125, %v352_v58  ;;  %v404_v2 = vmul.f32 0.001953125, %v392_v59  ;;  %v438_v58 = vld [vmem:[%s1249_s4 + $0x18] sm:$0xff] }
 0x1aa   :  { %v423_v0 = vadd.f32 1e-05, %v415_v60  ;;  %v408_v1 = vmul.f32 %v364_v61, %v364_v61 }
 0x1ab   :  { %v397_v3 = vpop.xlane.xlu1 %396  ;;  %v357_v6 = vpop.xlane.xlu0 %356 }
 0x1ac   :  { %662 = vrsqrt.f32 %v423_v0  ;;  %v412_v7 = vsub.f32 %v404_v2, %v408_v1  ;;  %v365_v8 = vmul.f32 0.001953125, %v357_v6  ;;  %v405_v10 = vmul.f32 0.001953125, %v397_v3 }
 0x1ae   :  { %v416_v9 = vmax.f32 %v412_v7, 0.0  ;;  %v409_v11 = vmul.f32 %v365_v8, %v365_v8 }
 0x1af   :  { %v362_v12 = vpop.xlane.xlu0 %361 }
 0x1b0   :  { %v424_v13 = vadd.f32 1e-05, %v416_v9  ;;  %v413_v14 = vsub.f32 %v405_v10, %v409_v11  ;;  %v366_v15 = vmul.f32 0.001953125, %v362_v12 }
 0x1b2   :  { %664 = vrsqrt.f32 %v424_v13  ;;  %v417_v17 = vmax.f32 %v413_v14, 0.0  ;;  %v410_v21 = vmul.f32 %v366_v15, %v366_v15 }
 0x1b3   :  { %v402_v19 = vpop.xlane.xlu0 %401 }
 0x1b4   :  { %v425_v20 = vadd.f32 1e-05, %v417_v17  ;;  %v406_v22 = vmul.f32 0.001953125, %v402_v19 }
 0x1b6   :  { %v663_v25 = vpop.eup %662  ;;  %666 = vrsqrt.f32 %v425_v20  ;;  %v414_v26 = vsub.f32 %v406_v22, %v410_v21 }
 0x1b7   :  { %v431_v27 = vmul.f32 %v663_v25, %v419_v24 }
 0x1b8   :  { %v418_v28 = vmax.f32 %v414_v26, 0.0 }
 0x1b9   :  { %449 = vperm.xlu1 %661, %v431_v27   ;;  %v439_v33 = vmul.f32 %v431_v27, %v363_v52 }
 0x1ba   :  { %v426_v29 = vadd.f32 1e-05, %v418_v28 }
 0x1bb   :  { %v443_v42 = vsub.f32 %v435_v37, %v439_v33 }
 0x1bc   :  { %v665_v31 = vpop.eup %664  ;;  %668 = vrsqrt.f32 %v426_v29 }
 0x1bd   :  { %v432_v32 = vmul.f32 %v665_v31, %v420_v30 }
 0x1bf   :  { %454 = vperm.xlu0 %660, %v432_v32   ;;  %v440_v44 = vmul.f32 %v432_v32, %v364_v61 }
 0x1c0   :  { %v667_v39 = vpop.eup %666 }
 0x1c1   :  { %v433_v40 = vmul.f32 %v667_v39, %v421_v36  ;;  %v444_v52 = vsub.f32 %v436_v45, %v440_v44 }
 0x1c3   :  { %v441_v49 = vmul.f32 %v433_v40, %v365_v8  ;;  %485 = vperm.xlu0 %660, %v443_v42   ;;  %459 = vperm.xlu1 %661, %v433_v40  }
 0x1c5   :  { %v445_v53 = vsub.f32 %v437_v46, %v441_v49 }
 0x1c6   :  { %v669_v54 = vpop.eup %668 }
 0x1c7   :  { %490 = vperm.xlu1 %661, %v444_v52   ;;  %495 = vperm.xlu0 %660, %v445_v53   ;;  %v434_v55 = vmul.f32 %v669_v54, %v422_v50 }
 0x1c9   :  { %v442_v56 = vmul.f32 %v434_v55, %v366_v15 }
 0x1cb   :  { %464 = vperm.xlu1 %661, %v434_v55   ;;  %v446_v59 = vsub.f32 %v438_v58, %v442_v56 }
 0x1cf   :  { %500 = vperm.xlu1 %661, %v446_v59  }
 0x238   :  { %v450_v60 = vpop.permute.xlu1 %449 }
 0x239   :  { %v467_v0 = vmul.f32 %v450_v60, %v1077_v35  ;;  %v468_v1 = vmul.f32 %v450_v60, %v1079_v38  ;;  %v469_v2 = vmul.f32 %v450_v60, %v1083_v41  ;;  %v470_v3 = vmul.f32 %v450_v60, %v1089_v47 }
 0x23e   :  { %v455_v61 = vpop.permute.xlu0 %454 }
 0x23f   :  { %v471_v12 = vmul.f32 %v455_v61, %v1091_v48  ;;  %v472_v13 = vmul.f32 %v455_v61, %v1093_v51  ;;  %v473_v14 = vmul.f32 %v455_v61, %v1100_v57  ;;  %v474_v35 = vmul.f32 %v455_v61, %v1107_v62 }
 0x242   :  { %v460_v6 = vpop.permute.xlu1 %459  ;;  %v486_v7 = vpop.permute.xlu0 %485 }
 0x243   :  { %v503_v8 = vadd.f32 %v486_v7, %v467_v0  ;;  %v504_v9 = vadd.f32 %v486_v7, %v468_v1  ;;  %v505_v10 = vadd.f32 %v486_v7, %v469_v2  ;;  %v506_v11 = vadd.f32 %v486_v7, %v470_v3 }
 0x244   :  { %v475_v41 = vmul.f32 %v460_v6, %v1109_v63  ;;  %v476_v48 = vmul.f32 %v460_v6, %v1113_v4  ;;  %v477_v51 = vmul.f32 %v460_v6, %v1115_v5  ;;  %v478_v62 = vmul.f32 %v460_v6, %v1128_v16 }
 0x245   :  { %670 = vtanh.f32 %v503_v8 }
 0x246   :  { %672 = vtanh.f32 %v504_v9  ;;  %v491_v38 = vpop.permute.xlu1 %490  ;;  %v496_v47 = vpop.permute.xlu0 %495 }
 0x247   :  { %674 = vtanh.f32 %v505_v10  ;;  %v507_v15 = vadd.f32 %v491_v38, %v471_v12  ;;  %v508_v17 = vadd.f32 %v491_v38, %v472_v13  ;;  %v509_v19 = vadd.f32 %v491_v38, %v473_v14 }
 0x248   :  { %676 = vtanh.f32 %v506_v11  ;;  %v510_v20 = vadd.f32 %v491_v38, %v474_v35  ;;  %v511_v57 = vadd.f32 %v496_v47, %v475_v41  ;;  %v512_v21 = vadd.f32 %v496_v47, %v476_v48 }
 0x249   :  { %678 = vtanh.f32 %v507_v15  ;;  %v513_v63 = vadd.f32 %v496_v47, %v477_v51  ;;  %v514_v24 = vadd.f32 %v496_v47, %v478_v62 }
 0x24a   :  { %680 = vtanh.f32 %v508_v17  ;;  %v465_v22 = vpop.permute.xlu1 %464 }
 0x24b   :  { %682 = vtanh.f32 %v509_v19  ;;  %v479_v25 = vmul.f32 %v465_v22, %v1130_v18  ;;  %v480_v26 = vmul.f32 %v465_v22, %v1134_v23  ;;  %v481_v4 = vmul.f32 %v465_v22, %v1146_v34 }
 0x24c   :  { %684 = vtanh.f32 %v510_v20  ;;  %v482_v5 = vmul.f32 %v465_v22, %v1152_v43 }
 0x24d   :  { %686 = vtanh.f32 %v511_v57 }
 0x24e   :  { %688 = vtanh.f32 %v512_v21  ;;  %v501_v27 = vpop.permute.xlu1 %500 }
 0x24f   :  { %v671_v28 = vpop.eup %670  ;;  %690 = vtanh.f32 %v513_v63  ;;  %v515_v16 = vadd.f32 %v501_v27, %v479_v25  ;;  %v516_v29 = vadd.f32 %v501_v27, %v480_v26  ;;  %v517_v30 = vadd.f32 %v501_v27, %v481_v4 }
 0x250   :  { %v673_v31 = vpop.eup %672  ;;  %535 = vst [vmem:[%s1250_s5] sm:$0xff] %v671_v28  ;;  %692 = vtanh.f32 %v514_v24  ;;  %v518_v18 = vadd.f32 %v501_v27, %v482_v5 }
 0x251   :  { %v675_v32 = vpop.eup %674  ;;  %536 = vst [vmem:[%s1250_s5 + $0x8] sm:$0xff] %v673_v31  ;;  %694 = vtanh.f32 %v515_v16 }
 0x252   :  { %v677_v23 = vpop.eup %676  ;;  %537 = vst [vmem:[%s1250_s5 + $0x10] sm:$0xff] %v675_v32  ;;  %696 = vtanh.f32 %v516_v29 }
 0x253   :  { %v679_v34 = vpop.eup %678  ;;  %538 = vst [vmem:[%s1250_s5 + $0x18] sm:$0xff] %v677_v23  ;;  %698 = vtanh.f32 %v517_v30 }
 0x254   :  { %v681_v43 = vpop.eup %680  ;;  %539 = vst [vmem:[%s1250_s5 + $0x20] sm:$0xff] %v679_v34  ;;  %700 = vtanh.f32 %v518_v18 }
 0x255   :  { %v683_v33 = vpop.eup %682  ;;  %540 = vst [vmem:[%s1250_s5 + $0x28] sm:$0xff] %v681_v43 }
 0x256   :  { %v685_v36 = vpop.eup %684  ;;  %541 = vst [vmem:[%s1250_s5 + $0x30] sm:$0xff] %v683_v33 }
 0x257   :  { %v687_v37 = vpop.eup %686  ;;  %542 = vst [vmem:[%s1250_s5 + $0x38] sm:$0xff] %v685_v36 }
 0x258   :  { %v689_v39 = vpop.eup %688  ;;  %543 = vst [vmem:[%s1250_s5 + $0x40] sm:$0xff] %v687_v37 }
 0x259   :  { %v691_v40 = vpop.eup %690  ;;  %544 = vst [vmem:[%s1250_s5 + $0x48] sm:$0xff] %v689_v39 }
 0x25a   :  { %v693_v42 = vpop.eup %692  ;;  %545 = vst [vmem:[%s1250_s5 + $0x50] sm:$0xff] %v691_v40 }
 0x25b   :  { %v695_v44 = vpop.eup %694  ;;  %546 = vst [vmem:[%s1250_s5 + $0x58] sm:$0xff] %v693_v42 }
 0x25c   :  { %v697_v45 = vpop.eup %696  ;;  %547 = vst [vmem:[%s1250_s5 + $0x60] sm:$0xff] %v695_v44 }
 0x25d   :  { %v699_v46 = vpop.eup %698  ;;  %548 = vst [vmem:[%s1250_s5 + $0x68] sm:$0xff] %v697_v45 }
 0x25e   :  { %v701_v49 = vpop.eup %700  ;;  %549 = vst [vmem:[%s1250_s5 + $0x70] sm:$0xff] %v699_v46 }
 0x25f   :  { %550 = vst [vmem:[%s1250_s5 + $0x78] sm:$0xff] %v701_v49 }

// kernel: sim_predictor_forward.5
= control target key start
LH: loop header
LB: loop body
LE: loop exit
PB: predicated region body
PF: predicated region fallthrough
CT: control target
= control target key end

     0   :  { %v771_v3 = vmov 0   ;;  %vm194_vm0 = vcmask 261120   ;;  %s1329_s0 = inlined_call_operand.vmem [shape: f32[288,512], index: 0, kind: input, shape index: {}]   ;;  %s1330_s1 = inlined_call_operand.vmem [shape: f32[32,288], index: 1, kind: input, shape index: {}]   ;;  %s1331_s2 = inlined_call_operand.vmem [shape: f32[32,1], index: 2, kind: input, shape index: {}]   ;;  %s1332_s3 = inlined_call_operand.vmem [shape: f32[32,512], index: 3, kind: output, shape index: {}]  }
   0x1   :  { %v27_v0 = vld [vmem:[%s1329_s0 + $0x8] sm:$0xff]  ;;  %v29_v2 = vld [vmem:[%s1329_s0 + $0x18] sm:$0xff]  ;;  %769 = vset.pattern.permute.xlu0 %v771_v3  ;;  %770 = vset.pattern.permute.xlu1 %v771_v3  ;;  %v26_v6 = vld [vmem:[%s1329_s0] sm:$0xff] }
   0x2   :  { %v31_v1 = vld [vmem:[%s1329_s0 + $0x28] sm:$0xff]  ;;  %v33_v5 = vld [vmem:[%s1329_s0 + $0x38] sm:$0xff]  ;;  %v30_v7 = vld [vmem:[%s1329_s0 + $0x20] sm:$0xff] }
   0x3   :  { %v591_v4 = vpack.c.bf16 %v31_v1, %v27_v0  ;;  %v663_v8 = vpack.c.bf16 %v33_v5, %v29_v2  ;;  %v593_v9 = vpack.c.bf16 %v30_v7, %v26_v6  ;;  %v28_v10 = vld [vmem:[%s1329_s0 + $0x10] sm:$0xff]  ;;  %v35_v12 = vld [vmem:[%s1329_s0 + $0x48] sm:$0xff]  ;;  %v37_v15 = vld [vmem:[%s1329_s0 + $0x58] sm:$0xff] }
   0x4   :  { %v32_v11 = vld [vmem:[%s1329_s0 + $0x30] sm:$0xff]  ;;  %v39_v14 = vld [vmem:[%s1329_s0 + $0x68] sm:$0xff]  ;;  %v41_v16 = vld [vmem:[%s1329_s0 + $0x78] sm:$0xff] }
   0x5   :  { %592 = vmatprep.subr.bf16.mxu0 %v591_v4  ;;  %v665_v13 = vpack.c.bf16 %v32_v11, %v28_v10  ;;  %664 = vmatprep.subr.bf16.mxu1 %v663_v8  ;;  %v595_v17 = vpack.c.bf16 %v39_v14, %v35_v12  ;;  %v667_v18 = vpack.c.bf16 %v41_v16, %v37_v15  ;;  %v34_v19 = vld [vmem:[%s1329_s0 + $0x40] sm:$0xff]  ;;  %v36_v21 = vld [vmem:[%s1329_s0 + $0x50] sm:$0xff]  ;;  %v43_v24 = vld [vmem:[%s1329_s0 + $0x88] sm:$0xff] }
   0x6   :  { %594 = vmatpush1.bf16.msra.mxu0 %v593_v9  ;;  %v38_v20 = vld [vmem:[%s1329_s0 + $0x60] sm:$0xff]  ;;  %v40_v23 = vld [vmem:[%s1329_s0 + $0x70] sm:$0xff]  ;;  %v47_v25 = vld [vmem:[%s1329_s0 + $0xa8] sm:$0xff] }
   0x7   :  { %666 = vmatpush1.bf16.msra.mxu1 %v665_v13  ;;  %v597_v22 = vpack.c.bf16 %v38_v20, %v34_v19  ;;  %596 = vmatprep.subr.bf16.mxu0 %v595_v17  ;;  %v669_v26 = vpack.c.bf16 %v40_v23, %v36_v21  ;;  %v599_v27 = vpack.c.bf16 %v47_v25, %v43_v24  ;;  %v45_v28 = vld [vmem:[%s1329_s0 + $0x98] sm:$0xff]  ;;  %v42_v30 = vld [vmem:[%s1329_s0 + $0x80] sm:$0xff]  ;;  %v44_v33 = vld [vmem:[%s1329_s0 + $0x90] sm:$0xff] }
   0x8   :  { %668 = vmatprep.subr.bf16.mxu1 %v667_v18  ;;  %v49_v29 = vld [vmem:[%s1329_s0 + $0xb8] sm:$0xff]  ;;  %v46_v32 = vld [vmem:[%s1329_s0 + $0xa0] sm:$0xff]  ;;  %v48_v34 = vld [vmem:[%s1329_s0 + $0xb0] sm:$0xff] }
   0x9   :  { %v671_v31 = vpack.c.bf16 %v49_v29, %v45_v28  ;;  %v601_v35 = vpack.c.bf16 %v46_v32, %v42_v30  ;;  %v51_v36 = vld [vmem:[%s1329_s0 + $0xc8] sm:$0xff]  ;;  %v53_v38 = vld [vmem:[%s1329_s0 + $0xd8] sm:$0xff]  ;;  %v673_v39 = vpack.c.bf16 %v48_v34, %v44_v33  ;;  %v50_v42 = vld [vmem:[%s1329_s0 + $0xc0] sm:$0xff] }
   0xa   :  { %598 = vmatpush1.bf16.msra.mxu0 %v597_v22  ;;  %v55_v37 = vld [vmem:[%s1329_s0 + $0xe8] sm:$0xff]  ;;  %v57_v41 = vld [vmem:[%s1329_s0 + $0xf8] sm:$0xff]  ;;  %v54_v43 = vld [vmem:[%s1329_s0 + $0xe0] sm:$0xff] }
   0xb   :  { %670 = vmatpush1.bf16.msra.mxu1 %v669_v26  ;;  %600 = vmatprep.subr.bf16.mxu0 %v599_v27  ;;  %v603_v40 = vpack.c.bf16 %v55_v37, %v51_v36  ;;  %v675_v44 = vpack.c.bf16 %v57_v41, %v53_v38  ;;  %v52_v45 = vld [vmem:[%s1329_s0 + $0xd0] sm:$0xff]  ;;  %v59_v47 = vld [vmem:[%s1329_s0 + $0x108] sm:$0xff]  ;;  %v61_v49 = vld [vmem:[%s1329_s0 + $0x118] sm:$0xff]  ;;  %v605_v51 = vpack.c.bf16 %v54_v43, %v50_v42 }
   0xc   :  { %672 = vmatprep.subr.bf16.mxu1 %v671_v31  ;;  %v56_v46 = vld [vmem:[%s1329_s0 + $0xf0] sm:$0xff]  ;;  %v63_v48 = vld [vmem:[%s1329_s0 + $0x128] sm:$0xff]  ;;  %v65_v50 = vld [vmem:[%s1329_s0 + $0x138] sm:$0xff] }
   0xd   :  { %v677_v52 = vpack.c.bf16 %v56_v46, %v52_v45  ;;  %v607_v53 = vpack.c.bf16 %v63_v48, %v59_v47  ;;  %v58_v54 = vld [vmem:[%s1329_s0 + $0x100] sm:$0xff]  ;;  %v60_v56 = vld [vmem:[%s1329_s0 + $0x110] sm:$0xff]  ;;  %v679_v57 = vpack.c.bf16 %v65_v50, %v61_v49  ;;  %v67_v59 = vld [vmem:[%s1329_s0 + $0x148] sm:$0xff] }
   0xe   :  { %602 = vmatpush1.bf16.msra.mxu0 %v601_v35  ;;  %v62_v55 = vld [vmem:[%s1329_s0 + $0x120] sm:$0xff]  ;;  %v64_v58 = vld [vmem:[%s1329_s0 + $0x130] sm:$0xff]  ;;  %v71_v60 = vld [vmem:[%s1329_s0 + $0x168] sm:$0xff] }
   0xf   :  { %674 = vmatpush1.bf16.msra.mxu1 %v673_v39  ;;  %604 = vmatprep.subr.bf16.mxu0 %v603_v40  ;;  %v69_v61 = vld [vmem:[%s1329_s0 + $0x158] sm:$0xff]  ;;  %v609_v63 = vpack.c.bf16 %v62_v55, %v58_v54  ;;  %v681_v0 = vpack.c.bf16 %v64_v58, %v60_v56  ;;  %v611_v1 = vpack.c.bf16 %v71_v60, %v67_v59  ;;  %v66_v2 = vld [vmem:[%s1329_s0 + $0x140] sm:$0xff]  ;;  %v68_v4 = vld [vmem:[%s1329_s0 + $0x150] sm:$0xff] }
  0x10   :  { %676 = vmatprep.subr.bf16.mxu1 %v675_v44  ;;  %v73_v62 = vld [vmem:[%s1329_s0 + $0x178] sm:$0xff]  ;;  %v70_v3 = vld [vmem:[%s1329_s0 + $0x160] sm:$0xff]  ;;  %v72_v6 = vld [vmem:[%s1329_s0 + $0x170] sm:$0xff] }
  0x11   :  { %v683_v5 = vpack.c.bf16 %v73_v62, %v69_v61  ;;  %v75_v7 = vld [vmem:[%s1329_s0 + $0x188] sm:$0xff]  ;;  %v77_v9 = vld [vmem:[%s1329_s0 + $0x198] sm:$0xff]  ;;  %v613_v11 = vpack.c.bf16 %v70_v3, %v66_v2  ;;  %v685_v12 = vpack.c.bf16 %v72_v6, %v68_v4  ;;  %v74_v14 = vld [vmem:[%s1329_s0 + $0x180] sm:$0xff] }
  0x12   :  { %606 = vmatpush1.bf16.msra.mxu0 %v605_v51  ;;  %v79_v8 = vld [vmem:[%s1329_s0 + $0x1a8] sm:$0xff]  ;;  %v81_v10 = vld [vmem:[%s1329_s0 + $0x1b8] sm:$0xff]  ;;  %v78_v15 = vld [vmem:[%s1329_s0 + $0x1a0] sm:$0xff] }
  0x13   :  { %678 = vmatpush1.bf16.msra.mxu1 %v677_v52  ;;  %608 = vmatprep.subr.bf16.mxu0 %v607_v53  ;;  %v615_v13 = vpack.c.bf16 %v79_v8, %v75_v7  ;;  %v76_v16 = vld [vmem:[%s1329_s0 + $0x190] sm:$0xff]  ;;  %v687_v17 = vpack.c.bf16 %v81_v10, %v77_v9  ;;  %v83_v19 = vld [vmem:[%s1329_s0 + $0x1c8] sm:$0xff]  ;;  %v85_v21 = vld [vmem:[%s1329_s0 + $0x1d8] sm:$0xff]  ;;  %v617_v23 = vpack.c.bf16 %v78_v15, %v74_v14 }
  0x14   :  { %680 = vmatprep.subr.bf16.mxu1 %v679_v57  ;;  %v80_v18 = vld [vmem:[%s1329_s0 + $0x1b0] sm:$0xff]  ;;  %v87_v20 = vld [vmem:[%s1329_s0 + $0x1e8] sm:$0xff]  ;;  %v89_v22 = vld [vmem:[%s1329_s0 + $0x1f8] sm:$0xff] }
  0x15   :  { %v689_v24 = vpack.c.bf16 %v80_v18, %v76_v16  ;;  %v619_v25 = vpack.c.bf16 %v87_v20, %v83_v19  ;;  %v82_v26 = vld [vmem:[%s1329_s0 + $0x1c0] sm:$0xff]  ;;  %v84_v28 = vld [vmem:[%s1329_s0 + $0x1d0] sm:$0xff]  ;;  %v691_v29 = vpack.c.bf16 %v89_v22, %v85_v21  ;;  %v91_v31 = vld [vmem:[%s1329_s0 + $0x208] sm:$0xff] }
  0x16   :  { %610 = vmatpush1.bf16.msra.mxu0 %v609_v63  ;;  %v86_v27 = vld [vmem:[%s1329_s0 + $0x1e0] sm:$0xff]  ;;  %v88_v30 = vld [vmem:[%s1329_s0 + $0x1f0] sm:$0xff]  ;;  %v95_v32 = vld [vmem:[%s1329_s0 + $0x228] sm:$0xff] }
  0x17   :  { %682 = vmatpush1.bf16.msra.mxu1 %v681_v0  ;;  %612 = vmatprep.subr.bf16.mxu0 %v611_v1  ;;  %v93_v33 = vld [vmem:[%s1329_s0 + $0x218] sm:$0xff]  ;;  %v621_v35 = vpack.c.bf16 %v86_v27, %v82_v26  ;;  %v693_v36 = vpack.c.bf16 %v88_v30, %v84_v28  ;;  %v623_v37 = vpack.c.bf16 %v95_v32, %v91_v31  ;;  %v90_v38 = vld [vmem:[%s1329_s0 + $0x200] sm:$0xff]  ;;  %v92_v40 = vld [vmem:[%s1329_s0 + $0x210] sm:$0xff] }
  0x18   :  { %684 = vmatprep.subr.bf16.mxu1 %v683_v5  ;;  %v97_v34 = vld [vmem:[%s1329_s0 + $0x238] sm:$0xff]  ;;  %v94_v39 = vld [vmem:[%s1329_s0 + $0x220] sm:$0xff]  ;;  %v96_v42 = vld [vmem:[%s1329_s0 + $0x230] sm:$0xff] }
  0x19   :  { %v695_v41 = vpack.c.bf16 %v97_v34, %v93_v33  ;;  %v99_v43 = vld [vmem:[%s1329_s0 + $0x248] sm:$0xff]  ;;  %v101_v45 = vld [vmem:[%s1329_s0 + $0x258] sm:$0xff]  ;;  %v625_v47 = vpack.c.bf16 %v94_v39, %v90_v38  ;;  %v697_v48 = vpack.c.bf16 %v96_v42, %v92_v40  ;;  %v98_v50 = vld [vmem:[%s1329_s0 + $0x240] sm:$0xff] }
  0x1a   :  { %614 = vmatpush1.bf16.msra.mxu0 %v613_v11  ;;  %v103_v44 = vld [vmem:[%s1329_s0 + $0x268] sm:$0xff]  ;;  %v105_v46 = vld [vmem:[%s1329_s0 + $0x278] sm:$0xff]  ;;  %v102_v51 = vld [vmem:[%s1329_s0 + $0x260] sm:$0xff] }
  0x1b   :  { %686 = vmatpush1.bf16.msra.mxu1 %v685_v12  ;;  %616 = vmatprep.subr.bf16.mxu0 %v615_v13  ;;  %v627_v49 = vpack.c.bf16 %v103_v44, %v99_v43  ;;  %v100_v52 = vld [vmem:[%s1329_s0 + $0x250] sm:$0xff]  ;;  %v699_v53 = vpack.c.bf16 %v105_v46, %v101_v45  ;;  %v107_v55 = vld [vmem:[%s1329_s0 + $0x288] sm:$0xff]  ;;  %v109_v57 = vld [vmem:[%s1329_s0 + $0x298] sm:$0xff]  ;;  %v629_v59 = vpack.c.bf16 %v102_v51, %v98_v50 }
  0x1c   :  { %688 = vmatprep.subr.bf16.mxu1 %v687_v17  ;;  %v104_v54 = vld [vmem:[%s1329_s0 + $0x270] sm:$0xff]  ;;  %v111_v56 = vld [vmem:[%s1329_s0 + $0x2a8] sm:$0xff]  ;;  %v113_v58 = vld [vmem:[%s1329_s0 + $0x2b8] sm:$0xff] }
  0x1d   :  { %v701_v60 = vpack.c.bf16 %v104_v54, %v100_v52  ;;  %v631_v61 = vpack.c.bf16 %v111_v56, %v107_v55  ;;  %v106_v62 = vld [vmem:[%s1329_s0 + $0x280] sm:$0xff]  ;;  %v108_v0 = vld [vmem:[%s1329_s0 + $0x290] sm:$0xff]  ;;  %v703_v1 = vpack.c.bf16 %v113_v58, %v109_v57  ;;  %v115_v3 = vld [vmem:[%s1329_s0 + $0x2c8] sm:$0xff] }
  0x1e   :  { %618 = vmatpush1.bf16.msra.mxu0 %v617_v23  ;;  %v110_v63 = vld [vmem:[%s1329_s0 + $0x2a0] sm:$0xff]  ;;  %v112_v2 = vld [vmem:[%s1329_s0 + $0x2b0] sm:$0xff]  ;;  %v119_v4 = vld [vmem:[%s1329_s0 + $0x2e8] sm:$0xff] }
  0x1f   :  { %690 = vmatpush1.bf16.msra.mxu1 %v689_v24  ;;  %620 = vmatprep.subr.bf16.mxu0 %v619_v25  ;;  %v117_v5 = vld [vmem:[%s1329_s0 + $0x2d8] sm:$0xff]  ;;  %v633_v7 = vpack.c.bf16 %v110_v63, %v106_v62  ;;  %v114_v8 = vld [vmem:[%s1329_s0 + $0x2c0] sm:$0xff]  ;;  %v705_v9 = vpack.c.bf16 %v112_v2, %v108_v0  ;;  %v635_v10 = vpack.c.bf16 %v119_v4, %v115_v3  ;;  %v116_v12 = vld [vmem:[%s1329_s0 + $0x2d0] sm:$0xff] }
  0x20   :  { %692 = vmatprep.subr.bf16.mxu1 %v691_v29  ;;  %v121_v6 = vld [vmem:[%s1329_s0 + $0x2f8] sm:$0xff]  ;;  %v118_v11 = vld [vmem:[%s1329_s0 + $0x2e0] sm:$0xff]  ;;  %v120_v13 = vld [vmem:[%s1329_s0 + $0x2f0] sm:$0xff] }
  0x21   :  { %v707_v14 = vpack.c.bf16 %v121_v6, %v117_v5  ;;  %v123_v15 = vld [vmem:[%s1329_s0 + $0x308] sm:$0xff]  ;;  %v125_v18 = vld [vmem:[%s1329_s0 + $0x318] sm:$0xff]  ;;  %v637_v20 = vpack.c.bf16 %v118_v11, %v114_v8  ;;  %v709_v21 = vpack.c.bf16 %v120_v13, %v116_v12  ;;  %v122_v23 = vld [vmem:[%s1329_s0 + $0x300] sm:$0xff] }
  0x22   :  { %622 = vmatpush1.bf16.msra.mxu0 %v621_v35  ;;  %v127_v16 = vld [vmem:[%s1329_s0 + $0x328] sm:$0xff]  ;;  %v129_v19 = vld [vmem:[%s1329_s0 + $0x338] sm:$0xff]  ;;  %v126_v24 = vld [vmem:[%s1329_s0 + $0x320] sm:$0xff] }
  0x23   :  { %694 = vmatpush1.bf16.msra.mxu1 %v693_v36  ;;  %624 = vmatprep.subr.bf16.mxu0 %v623_v37  ;;  %v15_v17 = vld [vmem:[%s1330_s1 + $0x8] sm:$0xff]  ;;  %v639_v22 = vpack.c.bf16 %v127_v16, %v123_v15  ;;  %v124_v25 = vld [vmem:[%s1329_s0 + $0x310] sm:$0xff]  ;;  %v711_v26 = vpack.c.bf16 %v129_v19, %v125_v18  ;;  %v133_v30 = vld [vmem:[%s1329_s0 + $0x358] sm:$0xff]  ;;  %v641_v32 = vpack.c.bf16 %v126_v24, %v122_v23 }
  0x24   :  { %696 = vmatprep.subr.bf16.mxu1 %v695_v41  ;;  %271 = vmatprep.mubr.f32.mxu0 %v15_v17  ;;  %v128_v27 = vld [vmem:[%s1329_s0 + $0x330] sm:$0xff]  ;;  %v131_v28 = vld [vmem:[%s1329_s0 + $0x348] sm:$0xff]  ;;  %v137_v31 = vld [vmem:[%s1329_s0 + $0x378] sm:$0xff] }
  0x25   :  { %449 = vmatprep.mubr.f32.mxu1 %v15_v17  ;;  %v135_v29 = vld [vmem:[%s1329_s0 + $0x368] sm:$0xff]  ;;  %v713_v33 = vpack.c.bf16 %v128_v27, %v124_v25  ;;  %v130_v35 = vld [vmem:[%s1329_s0 + $0x340] sm:$0xff]  ;;  %v132_v37 = vld [vmem:[%s1329_s0 + $0x350] sm:$0xff]  ;;  %v715_v38 = vpack.c.bf16 %v137_v31, %v133_v30 }
  0x26   :  { %626 = vmatpush1.bf16.msra.mxu0 %v625_v47  ;;  %v643_v34 = vpack.c.bf16 %v135_v29, %v131_v28  ;;  %v134_v36 = vld [vmem:[%s1329_s0 + $0x360] sm:$0xff]  ;;  %v136_v39 = vld [vmem:[%s1329_s0 + $0x370] sm:$0xff]  ;;  %v139_v40 = vld [vmem:[%s1329_s0 + $0x388] sm:$0xff] }
  0x27   :  { %698 = vmatpush1.bf16.msra.mxu1 %v697_v48  ;;  %628 = vmatprep.subr.bf16.mxu0 %v627_v49  ;;  %v143_v41 = vld [vmem:[%s1329_s0 + $0x3a8] sm:$0xff]  ;;  %v141_v42 = vld [vmem:[%s1329_s0 + $0x398] sm:$0xff]  ;;  %v645_v44 = vpack.c.bf16 %v134_v36, %v130_v35  ;;  %v170_v45 = vld [vmem:[%s1331_s2] sm:$0xff]  ;;  %v717_v47 = vpack.c.bf16 %v136_v39, %v132_v37  ;;  %v772_v37 = vmov 0.0  }
  0x28   :  { %700 = vmatprep.subr.bf16.mxu1 %v699_v53  ;;  %v145_v43 = vld [vmem:[%s1329_s0 + $0x3b8] sm:$0xff]  ;;  %v172_v46 = vld [vmem:[%s1331_s2 + $0x10] sm:$0xff]  ;;  %v647_v48 = vpack.c.bf16 %v143_v41, %v139_v40  ;;  %v138_v49 = vld [vmem:[%s1329_s0 + $0x380] sm:$0xff]  ;;  %176 = vperm.xlu0 %769, %v170_v45  }
  0x29   :  { %v142_v50 = vld [vmem:[%s1329_s0 + $0x3a0] sm:$0xff]  ;;  %v140_v51 = vld [vmem:[%s1329_s0 + $0x390] sm:$0xff]  ;;  %v719_v52 = vpack.c.bf16 %v145_v43, %v141_v42  ;;  %v147_v54 = vld [vmem:[%s1329_s0 + $0x3c8] sm:$0xff]  ;;  %186 = vperm.xlu1 %770, %v172_v46  }
  0x2a   :  { %630 = vmatpush1.bf16.msra.mxu0 %v629_v59  ;;  %v144_v53 = vld [vmem:[%s1329_s0 + $0x3b0] sm:$0xff]  ;;  %v151_v55 = vld [vmem:[%s1329_s0 + $0x3e8] sm:$0xff]  ;;  %v149_v56 = vld [vmem:[%s1329_s0 + $0x3d8] sm:$0xff]  ;;  %v649_v59 = vpack.c.bf16 %v142_v50, %v138_v49 }
  0x2b   :  { %702 = vmatpush1.bf16.msra.mxu1 %v701_v60  ;;  %632 = vmatprep.subr.bf16.mxu0 %v631_v61  ;;  %v153_v57 = vld [vmem:[%s1329_s0 + $0x3f8] sm:$0xff]  ;;  %v171_v58 = vld [vmem:[%s1331_s2 + $0x8] sm:$0xff]  ;;  %v721_v61 = vpack.c.bf16 %v144_v53, %v140_v51  ;;  %v651_v62 = vpack.c.bf16 %v151_v55, %v147_v54  ;;  %v146_v63 = vld [vmem:[%s1329_s0 + $0x3c0] sm:$0xff] }
  0x2c   :  { %704 = vmatprep.subr.bf16.mxu1 %v703_v1  ;;  %v173_v60 = vld [vmem:[%s1331_s2 + $0x18] sm:$0xff]  ;;  %v150_v0 = vld [vmem:[%s1329_s0 + $0x3e0] sm:$0xff]  ;;  %v148_v1 = vld [vmem:[%s1329_s0 + $0x3d0] sm:$0xff]  ;;  %v723_v2 = vpack.c.bf16 %v153_v57, %v149_v56  ;;  %181 = vperm.xlu0 %769, %v171_v58  }
  0x2d   :  { %v152_v3 = vld [vmem:[%s1329_s0 + $0x3f0] sm:$0xff]  ;;  %v155_v4 = vld [vmem:[%s1329_s0 + $0x408] sm:$0xff]  ;;  %v157_v6 = vld [vmem:[%s1329_s0 + $0x418] sm:$0xff]  ;;  %191 = vperm.xlu1 %770, %v173_v60   ;;  %v653_v8 = vpack.c.bf16 %v150_v0, %v146_v63 }
  0x2e   :  { %634 = vmatpush1.bf16.msra.mxu0 %v633_v7  ;;  %v159_v5 = vld [vmem:[%s1329_s0 + $0x428] sm:$0xff]  ;;  %v161_v7 = vld [vmem:[%s1329_s0 + $0x438] sm:$0xff]  ;;  %v154_v11 = vld [vmem:[%s1329_s0 + $0x400] sm:$0xff] }
  0x2f   :  { %706 = vmatpush1.bf16.msra.mxu1 %v705_v9  ;;  %636 = vmatprep.subr.bf16.mxu0 %v635_v10  ;;  %v725_v9 = vpack.c.bf16 %v152_v3, %v148_v1  ;;  %v655_v10 = vpack.c.bf16 %v159_v5, %v155_v4  ;;  %v158_v12 = vld [vmem:[%s1329_s0 + $0x420] sm:$0xff]  ;;  %v727_v13 = vpack.c.bf16 %v161_v7, %v157_v6  ;;  %v160_v15 = vld [vmem:[%s1329_s0 + $0x430] sm:$0xff]  ;;  %v163_v16 = vld [vmem:[%s1329_s0 + $0x448] sm:$0xff] }
  0x30   :  { %708 = vmatprep.subr.bf16.mxu1 %v707_v14  ;;  %v156_v14 = vld [vmem:[%s1329_s0 + $0x410] sm:$0xff]  ;;  %v167_v17 = vld [vmem:[%s1329_s0 + $0x468] sm:$0xff]  ;;  %v14_v18 = vld [vmem:[%s1330_s1] sm:$0xff]  ;;  %v657_v19 = vpack.c.bf16 %v158_v12, %v154_v11 }
  0x31   :  { %v18_v23 = vld [vmem:[%s1330_s1 + $0x20] sm:$0xff]  ;;  %v659_v24 = vpack.c.bf16 %v167_v17, %v163_v16  ;;  %v164_v28 = vld [vmem:[%s1329_s0 + $0x450] sm:$0xff]  ;;  %v17_v30 = vld [vmem:[%s1330_s1 + $0x18] sm:$0xff] }
  0x32   :  { %638 = vmatpush1.bf16.msra.mxu0 %v637_v20  ;;  %v165_v20 = vld [vmem:[%s1329_s0 + $0x458] sm:$0xff]  ;;  %v162_v25 = vld [vmem:[%s1329_s0 + $0x440] sm:$0xff]  ;;  %v168_v29 = vld [vmem:[%s1329_s0 + $0x470] sm:$0xff] }
  0x33   :  { %710 = vmatpush1.bf16.msra.mxu1 %v709_v21  ;;  %640 = vmatprep.subr.bf16.mxu0 %v639_v22  ;;  %v169_v21 = vld [vmem:[%s1329_s0 + $0x478] sm:$0xff]  ;;  %v729_v22 = vpack.c.bf16 %v160_v15, %v156_v14  ;;  %v24_v35 = vld [vmem:[%s1330_s1 + $0x50] sm:$0xff]  ;;  %v23_v36 = vld [vmem:[%s1330_s1 + $0x48] sm:$0xff] }
  0x34   :  { %712 = vmatprep.subr.bf16.mxu1 %v711_v26  ;;  %v166_v26 = vld [vmem:[%s1329_s0 + $0x460] sm:$0xff]  ;;  %v731_v27 = vpack.c.bf16 %v169_v21, %v165_v20  ;;  %v21_v31 = vld [vmem:[%s1330_s1 + $0x38] sm:$0xff]  ;;  %v19_v39 = vld [vmem:[%s1330_s1 + $0x28] sm:$0xff] }
  0x35   :  { %v22_v40 = vld [vmem:[%s1330_s1 + $0x40] sm:$0xff]  ;;  %v25_v41 = vld [vmem:[%s1330_s1 + $0x58] sm:$0xff] }
  0x36   :  { %642 = vmatpush1.bf16.msra.mxu0 %v641_v32  ;;  %v661_v32 = vpack.c.bf16 %v166_v26, %v162_v25 }
  0x37   :  { %714 = vmatpush1.bf16.msra.mxu1 %v713_v33  ;;  %644 = vmatprep.subr.bf16.mxu0 %v643_v34  ;;  %v733_v33 = vpack.c.bf16 %v168_v29, %v164_v28  ;;  %v20_v34 = vld [vmem:[%s1330_s1 + $0x30] sm:$0xff] }
  0x38   :  { %716 = vmatprep.subr.bf16.mxu1 %v715_v38  ;;  %v16_v38 = vld [vmem:[%s1330_s1 + $0x10] sm:$0xff] }
  0x3a   :  { %646 = vmatpush1.bf16.msra.mxu0 %v645_v44 }
  0x3b   :  { %718 = vmatpush1.bf16.msra.mxu1 %v717_v47  ;;  %648 = vmatprep.subr.bf16.mxu0 %v647_v48 }
  0x3c   :  { %720 = vmatprep.subr.bf16.mxu1 %v719_v52 }
  0x3e   :  { %650 = vmatpush1.bf16.msra.mxu0 %v649_v59 }
  0x3f   :  { %722 = vmatpush1.bf16.msra.mxu1 %v721_v61  ;;  %652 = vmatprep.subr.bf16.mxu0 %v651_v62 }
  0x40   :  { %724 = vmatprep.subr.bf16.mxu1 %v723_v2 }
  0x42   :  { %654 = vmatpush1.bf16.msra.mxu0 %v653_v8 }
  0x43   :  { %726 = vmatpush1.bf16.msra.mxu1 %v725_v9  ;;  %656 = vmatprep.subr.bf16.mxu0 %v655_v10 }
  0x44   :  { %728 = vmatprep.subr.bf16.mxu1 %v727_v13 }
  0x45   :  { %272 = vmatmul.mubr.f32.vlgmr.msra.gmra.mrb[0].mxu0 %v14_v18 }
  0x46   :  { %450 = vmatmul.mubr.f32.vlgmr.msra.gmra.mrb[0].mxu1 %v14_v18  ;;  %658 = vmatpush1.bf16.msra.mxu0 %v657_v19 }
  0x47   :  { %730 = vmatpush1.bf16.msra.mxu1 %v729_v22  ;;  %277 = vmatprep.mubr.f32.mxu0 %v18_v23 }
  0x48   :  { %455 = vmatprep.mubr.f32.mxu1 %v18_v23  ;;  %660 = vmatprep.subr.bf16.mxu0 %v659_v24 }
  0x49   :  { %278 = vmatmul.mubr.f32.gmra.mrb[2].mxu0 %v17_v30  ;;  %732 = vmatprep.subr.bf16.mxu1 %v731_v27 }
  0x4a   :  { %456 = vmatmul.mubr.f32.gmra.mrb[2].mxu1 %v17_v30  ;;  %283 = vmatprep.mubr.f32.mxu0 %v21_v31 }
  0x4b   :  { %461 = vmatprep.mubr.f32.mxu1 %v21_v31  ;;  %662 = vmatpush1.bf16.msra.mxu0 %v661_v32 }
  0x4c   :  { %734 = vmatpush1.bf16.msra.mxu1 %v733_v33 }
  0x4d   :  { %284 = vmatmul.mubr.f32.gmra.mrb[4].mxu0 %v20_v34 }
  0x4e   :  { %462 = vmatmul.mubr.f32.gmra.mrb[4].mxu1 %v20_v34  ;;  %289 = vmatprep.mubr.f32.mxu0 %v24_v35 }
  0x4f   :  { %467 = vmatprep.mubr.f32.mxu1 %v24_v35 }
  0x51   :  { %290 = vmatmul.mubr.f32.gmra.mrb[6].mxu0 %v23_v36 }
  0x52   :  { %468 = vmatmul.mubr.f32.gmra.mrb[6].mxu1 %v23_v36  ;;  %360 = vmatprep.mubr.f32.mxu0 %v772_v37 }
  0x53   :  { %538 = vmatprep.mubr.f32.mxu1 %v772_v37 }
  0x55   :  { %583 = vmatmul.mubr.msk.f32.vlgmr.msra.gmra.mrb[0].mxu0 %vm194_vm0, %v16_v38 }
  0x56   :  { %587 = vmatmul.mubr.msk.f32.vlgmr.msra.gmra.mrb[0].mxu1 %vm194_vm0, %v16_v38  ;;  %366 = vmatprep.mubr.f32.mxu0 %v772_v37 }
  0x57   :  { %544 = vmatprep.mubr.f32.mxu1 %v772_v37 }
  0x59   :  { %584 = vmatmul.mubr.msk.f32.gmra.mrb[2].mxu0 %vm194_vm0, %v19_v39 }
  0x5a   :  { %588 = vmatmul.mubr.msk.f32.gmra.mrb[2].mxu1 %vm194_vm0, %v19_v39  ;;  %372 = vmatprep.mubr.f32.mxu0 %v772_v37 }
  0x5b   :  { %550 = vmatprep.mubr.f32.mxu1 %v772_v37 }
  0x5d   :  { %585 = vmatmul.mubr.msk.f32.gmra.mrb[4].mxu0 %vm194_vm0, %v22_v40 }
  0x5e   :  { %589 = vmatmul.mubr.msk.f32.gmra.mrb[4].mxu1 %vm194_vm0, %v22_v40  ;;  %378 = vmatprep.mubr.f32.mxu0 %v772_v37 }
  0x5f   :  { %556 = vmatprep.mubr.f32.mxu1 %v772_v37 }
  0x61   :  { %586 = vmatmul.mubr.msk.f32.gmra.mrb[6].mxu0 %vm194_vm0, %v25_v41 }
  0x62   :  { %590 = vmatmul.mubr.msk.f32.gmra.mrb[6].mxu1 %vm194_vm0, %v25_v41 }
  0xa7   :  { %v177_v42 = vpop.permute.xlu0 %176 }
  0xa8   :  { %v187_v59 = vpop.permute.xlu1 %186 }
  0xab   :  { %v182_v50 = vpop.permute.xlu0 %181 }
  0xac   :  { %v192_v5 = vpop.permute.xlu1 %191 }
 0x128   :  { %v362_v43 = vpop.f32.mrb[0].mxu0 }
 0x129   :  { %v735_v44 = vadd.f32 %v362_v43, %v177_v42  ;;  %v540_v45 = vpop.f32.mrb[0].mxu1  ;;  %v364_v46 = vpop.f32.mrb[1].mxu0 }
 0x12a   :  { %v743_v47 = vadd.f32 %v540_v45, %v177_v42  ;;  %v736_v48 = vadd.f32 %v364_v46, %v177_v42  ;;  %v542_v49 = vpop.f32.mrb[1].mxu1 }
 0x12b   :  { %563 = vst [vmem:[%s1332_s3] sm:$0xff] %v735_v44  ;;  %v744_v51 = vadd.f32 %v542_v49, %v177_v42 }
 0x12c   :  { %565 = vst [vmem:[%s1332_s3 + $0x10] sm:$0xff] %v743_v47  ;;  %564 = vst [vmem:[%s1332_s3 + $0x8] sm:$0xff] %v736_v48  ;;  %v368_v52 = vpop.f32.mrb[2].mxu0 }
 0x12d   :  { %566 = vst [vmem:[%s1332_s3 + $0x18] sm:$0xff] %v744_v51  ;;  %v737_v53 = vadd.f32 %v368_v52, %v182_v50  ;;  %v546_v54 = vpop.f32.mrb[2].mxu1  ;;  %v370_v55 = vpop.f32.mrb[3].mxu0 }
 0x12e   :  { %v745_v56 = vadd.f32 %v546_v54, %v182_v50  ;;  %v738_v57 = vadd.f32 %v370_v55, %v182_v50  ;;  %v548_v58 = vpop.f32.mrb[3].mxu1 }
 0x12f   :  { %567 = vst [vmem:[%s1332_s3 + $0x20] sm:$0xff] %v737_v53  ;;  %v746_v60 = vadd.f32 %v548_v58, %v182_v50 }
 0x130   :  { %569 = vst [vmem:[%s1332_s3 + $0x30] sm:$0xff] %v745_v56  ;;  %568 = vst [vmem:[%s1332_s3 + $0x28] sm:$0xff] %v738_v57  ;;  %v374_v61 = vpop.f32.mrb[4].mxu0 }
 0x131   :  { %570 = vst [vmem:[%s1332_s3 + $0x38] sm:$0xff] %v746_v60  ;;  %v739_v62 = vadd.f32 %v374_v61, %v187_v59  ;;  %v552_v63 = vpop.f32.mrb[4].mxu1  ;;  %v376_v0 = vpop.f32.mrb[5].mxu0 }
 0x132   :  { %v747_v1 = vadd.f32 %v552_v63, %v187_v59  ;;  %v740_v2 = vadd.f32 %v376_v0, %v187_v59  ;;  %v554_v3 = vpop.f32.mrb[5].mxu1 }
 0x133   :  { %571 = vst [vmem:[%s1332_s3 + $0x40] sm:$0xff] %v739_v62  ;;  %v748_v4 = vadd.f32 %v554_v3, %v187_v59 }
 0x134   :  { %573 = vst [vmem:[%s1332_s3 + $0x50] sm:$0xff] %v747_v1  ;;  %572 = vst [vmem:[%s1332_s3 + $0x48] sm:$0xff] %v740_v2  ;;  %v380_v6 = vpop.f32.mrb[6].mxu0 }
 0x135   :  { %574 = vst [vmem:[%s1332_s3 + $0x58] sm:$0xff] %v748_v4  ;;  %v741_v7 = vadd.f32 %v380_v6, %v192_v5  ;;  %v558_v8 = vpop.f32.mrb[6].mxu1  ;;  %v382_v9 = vpop.f32.mrb[7].mxu0 }
 0x136   :  { %v749_v10 = vadd.f32 %v558_v8, %v192_v5  ;;  %v742_v11 = vadd.f32 %v382_v9, %v192_v5  ;;  %v560_v12 = vpop.f32.mrb[7].mxu1 }
 0x137   :  { %575 = vst [vmem:[%s1332_s3 + $0x60] sm:$0xff] %v741_v7  ;;  %v750_v13 = vadd.f32 %v560_v12, %v192_v5 }
 0x138   :  { %577 = vst [vmem:[%s1332_s3 + $0x70] sm:$0xff] %v749_v10  ;;  %576 = vst [vmem:[%s1332_s3 + $0x68] sm:$0xff] %v742_v11 }
 0x139   :  { %578 = vst [vmem:[%s1332_s3 + $0x78] sm:$0xff] %v750_v13 }

// kernel: sim_predictor_forward.3
= control target key start
LH: loop header
LB: loop body
LE: loop exit
PB: predicated region body
PF: predicated region fallthrough
CT: control target
= control target key end

     0   :  { %s1776_s18 = smov 0   ;;  %s1973_s0 = inlined_call_operand.vmem [shape: f32[2,16,32], index: 0, kind: input, shape index: {}]   ;;  %s1974_s1 = inlined_call_operand.vmem [shape: f32[2,32,64], index: 1, kind: input, shape index: {}]   ;;  %s1975_s2 = inlined_call_operand.vmem [shape: f32[2,16,64], index: 2, kind: input, shape index: {}]   ;;  %s1976_s3 = inlined_call_operand.vmem [shape: f32[2,1,64], index: 3, kind: input, shape index: {}]   ;;  %s1977_s4 = inlined_call_operand.vmem [shape: s32[2,2,2], index: 4, kind: input, shape index: {}]   ;;  %s1978_s5 = inlined_call_operand.vmem [shape: f32[2,2,2,16], index: 5, kind: output, shape index: {}]  }
   0x1 LB: > { %s1471_s19 = sadd.s32 4294967295, %s1734_s18   ;;  %p1475_p0 = scmp.ge.s32.totalorder %s1734_s18, 1  ;;  %s1734_s18 = sphi %s1776_s18, %s15_s18  }
   0x2   : > { %p224_p1 = scmp.lt.s32.totalorder %s1734_s18, 3 }
   0x4   : > { %p225_p2 = pnand %p1475_p0, %p224_p1 }
   0x5   : > { %p269_p3 = scmp.lt.s32.totalorder (!%p225_p2), %s1471_s19, 1  ;;  %v1736_v0 = vmov (!%p225_p2), 0.0|0.0   ;;  %vm1737_vm0 = vmmov (!%p225_p2), 0   ;;  %v1738_v1 = vmov (!%p225_p2), 0.0   ;;  %vm309_vm1 = vcmask (!%p225_p2), 261120   ;;  %s1739_s9 = smov (!%p225_p2), 96  }
   0x6   : > { %228 = sbr.rel (%p225_p2) target bundleno = 5688 (0x1638), region = 40  ;;  %1615 = vmatprep.subr.bf16.mxu1 (!%p225_p2), %v1736_v0  ;;  %1555 = vmatprep.mubr.msk.f32.mxu1 (!%p225_p2), %vm1737_vm0, %v1738_v1  ;;  %s1740_s10 = smov (!%p225_p2), 16   ;;  %vm394_vm2 = vcmask (!%p225_p2), 130048  }
   0x7   : > { %s1741_s11 = smov (!%p225_p2), 32   ;;  %s1742_s12 = smov (!%p225_p2), 80  }
   0x8   : > { %s1745_s17 = smov (!%p225_p2), 48  }
   0xd   : > { %s1980_s19 = smov (!%p269_p3, %s1471_s19), 1 }
   0xe   : > { %s1507_s20 = sshll.u32 %s1980_s19, 5  ;;  %s1506_s21 = sshll.u32 %s1980_s19, 4 }
   0xf   : > { %s278_s24 = scalar_lea.vmem %s1974_s1, %s1507_s20  ;;  %s273_s27 = scalar_lea.vmem %s1973_s0, %s1506_s21 }
  0x10   : > { %v298_v2 = vld [vmem:[%s278_s24] sm:$0xff]  ;;  %v299_v3 = vld [vmem:[%s278_s24 + $0x8] sm:$0xff]  ;;  %v300_v4 = vld [vmem:[%s278_s24 + $0x10] sm:$0xff]  ;;  %s283_s30 = scalar_lea.vmem %s1975_s2, %s1506_s21  ;;  %s286_s8 = scalar_lea.vmem %s1976_s3, %s1980_s19 }
  0x11   : > { %v1607_v5 = vpack.c.bf16 %v299_v3, %v298_v2  ;;  %v301_v6 = vld [vmem:[%s278_s24 + $0x18] sm:$0xff]  ;;  %v296_v7 = vld [vmem:[%s273_s27] sm:$0xff]  ;;  %v393_v10 = vld [vmem:[%s283_s30 + $0x8] sm:$0xff]  ;;  %s1482_s13 = sshll.u32 %s1980_s19, 1  ;;  %s1509_s20 = sshll.u32 %s1980_s19, 2 }
  0x12   : > { %v1611_v8 = vpack.c.bf16 %v301_v6, %v300_v4  ;;  %1548 = vmatprep.mubr.msk.f32.mxu0 %vm309_vm1, %v296_v7  ;;  %v392_v9 = vld [vmem:[%s283_s30] sm:$0xff]  ;;  %v297_v12 = vld [vmem:[%s273_s27 + $0x8] sm:$0xff]  ;;  %s290_s16 = scalar_lea.vmem %s1977_s4, %s1482_s13  ;;  %s295_s23 = scalar_lea.vmem %s1978_s5, %s1509_s20 }
  0x13   : > { %1608 = vmatprep.subr.bf16.mxu0 %v1607_v5  ;;  %v1801_v11 = vpack.c.bf16 %v393_v10, %v392_v9  ;;  %v1485_v14 = vld [vmem:[%s286_s8] ss:$0 sm:$0xff] }
  0x14   : > { %1610 = vmatpush3.bf16.msra.mxu0 %v1607_v5 }
  0x15   : > { %1612 = vmatprep.subr.bf16.mxu0 %v1611_v8  ;;  %1617 = vmatpush3.bf16.msra.mxu1 %v1801_v11 }
  0x16   : > { %1618 = vmatprep.subr.bf16.mxu1 %v1736_v0 }
  0x18   : > { %1614 = vmatpush3.bf16.msra.mxu0 %v1611_v8  ;;  %1556 = vmatmul.mubr.f32.vlgmr.msra.gmra.mrb[0].mxu1 %v1738_v1 }
  0x19   : > { %1620 = vmatpush3.bf16.msra.mxu1 %v1801_v11  ;;  %1562 = vmatprep.mubr.msk.f32.mxu1 %vm1737_vm0, %v1738_v1 }
  0x1a   : > { %1621 = vmatprep.subr.bf16.mxu0 %v1736_v0  ;;  %1624 = vmatprep.subr.bf16.mxu1 %v1736_v0 }
  0x1b   : > { %1549 = vmatmul.mubr.msk.f32.vlgmr.msra.gmra.mrb[0].mxu0 %vm309_vm1, %v297_v12 }
  0x1c   : > { %1623 = vmatpush3.bf16.msra.mxu0 %v1801_v11  ;;  %1569 = vmatprep.mubr.msk.f32.mxu0 %vm1737_vm0, %v1738_v1 }
  0x1d   : > { %1627 = vmatprep.subr.bf16.mxu0 %v1736_v0 }
  0xeb   : > { %v464_v13 = vpop.f32.mrb[0].mxu1 }
  0xec   : > { %v1557_v15 = vpop.f32.mrb[1].mxu1 }
  0xee   : > { %v1550_v16 = vpop.f32.mrb[0].mxu0 }
  0xef   : > { %v1820_v17 = vadd.f32 %v1550_v16, %v1485_v14  ;;  %v382_v18 = vpop.f32.mrb[1].mxu0 }
  0xf0   : > { %v1822_v19 = vadd.f32 %v1485_v14, %v382_v18 }
  0xf2   : > { %v468_v20 = vadd.f32 %v464_v13, %v1822_v19 }
  0xf4   : > { %1664 = vtanh.f32 %v468_v20  ;;  %v1488_v22 = vmul.f32 -1.442695, %v468_v20 }
  0xf6   : > { %1666 = vpow2.f32 %v1488_v22 }
  0xfe   : > { %v1665_v21 = vpop.eup %1664 }
  0xff   : > { %478 = vrot.lane.b32.xlu0 %v1665_v21, %s1739_s9 }
 0x100   : > { %v1667_v23 = vpop.eup %1666 }
 0x101   : > { %v472_v24 = vadd.f32 1.0, %v1667_v23 }
 0x103   : > { %1668 = vrcp.f32 %v472_v24 }
 0x10d   : > { %v1669_v25 = vpop.eup %1668 }
 0x10e   : > { %v476_v28 = vmul.f32 0.0, %v1669_v25 }
 0x171   : > { %v479_v26 = vpop.permute.xlu0 %478 }
 0x172   : > { %v481_v27 = vmul.f32 %v1669_v25, %v479_v26 }
 0x174   : > { %483 = vrot.lane.b32.xlu0 %v481_v27, %s1740_s10 }
 0x1e6   : > { %v484_v29 = vpop.permute.xlu0 %483 }
 0x1e7   : > { %v486_v30 = vadd.f32 %v484_v29, %v476_v28 }
 0x1e9   : > { %1670 = vtanh.f32 %v486_v30  ;;  %v592_v46 = vrot.slane %v486_v30, 6 }
 0x1f3   : > { %v1671_v31 = vpop.eup %1670 }
 0x1f4   : > { %489 = vrot.lane.b32.xlu1 %v1671_v31, %s1741_s11 }
 0x266   : > { %v490_v32 = vpop.permute.xlu1 %489 }
 0x267   : > { %v1828_v33 = vmul.f32 %v1669_v25, %v490_v32 }
 0x269   : > { %506 = vrot.lane.b32.xlu1 %v1828_v33, %s1742_s12 }
 0x2db   : > { %v507_v34 = vpop.permute.xlu1 %506 }
 0x2dc   : > { %1563 = vmatmul.mubr.msk.f32.vlgmr.msra.gmra.mrb[2].mxu1 %vm394_vm2, %v507_v34 }
 0x2dd   : > { %1626 = vmatpush3.bf16.msra.mxu1 %v1801_v11  ;;  %1576 = vmatprep.mubr.msk.f32.mxu1 %vm1737_vm0, %v1738_v1 }
 0x2de   : > { %1630 = vmatprep.subr.bf16.mxu1 %v1736_v0 }
 0x3af   : > { %v576_v35 = vpop.f32.mrb[2].mxu1 }
 0x3b0   : > { %v581_v36 = vrot.slane %v576_v35, 6  ;;  %v1564_v37 = vpop.f32.mrb[3].mxu1 }
 0x3b2   : > { %v583_v38 = vadd.f32 %v581_v36, %v1822_v19 }
 0x3b4   : > { %1672 = vtanh.f32 %v583_v38  ;;  %v1490_v40 = vmul.f32 -1.442695, %v583_v38 }
 0x3b6   : > { %1674 = vpow2.f32 %v1490_v40 }
 0x3be   : > { %v1673_v39 = vpop.eup %1672 }
 0x3bf   : > { %596 = vrot.lane.b32.xlu0 %v1673_v39, %s1739_s9 }
 0x3c0   : > { %v1675_v41 = vpop.eup %1674 }
 0x3c1   : > { %v587_v42 = vadd.f32 1.0, %v1675_v41 }
 0x3c3   : > { %1676 = vrcp.f32 %v587_v42 }
 0x3cd   : > { %v1677_v43 = vpop.eup %1676 }
 0x3ce   : > { %v594_v47 = vmul.f32 %v1677_v43, %v592_v46 }
 0x431   : > { %v597_v44 = vpop.permute.xlu0 %596 }
 0x432   : > { %v599_v45 = vmul.f32 %v1677_v43, %v597_v44 }
 0x434   : > { %601 = vrot.lane.b32.xlu1 %v599_v45, %s1740_s10 }
 0x4a6   : > { %v602_v48 = vpop.permute.xlu1 %601 }
 0x4a7   : > { %v604_v49 = vadd.f32 %v602_v48, %v594_v47 }
 0x4a9   : > { %1678 = vtanh.f32 %v604_v49  ;;  %v720_v4 = vrot.slane %v604_v49, 6 }
 0x4b3   : > { %v1679_v50 = vpop.eup %1678 }
 0x4b4   : > { %607 = vrot.lane.b32.xlu0 %v1679_v50, %s1741_s11 }
 0x526   : > { %v608_v51 = vpop.permute.xlu0 %607 }
 0x527   : > { %v610_v52 = vmul.f32 %v1677_v43, %v608_v51 }
 0x529   : > { %v618_v53 = vrot.slane %v610_v52, 2 }
 0x52b   : > { %619 = vrot.lane.b32.xlu1 %v618_v53, %s1742_s12 }
 0x59d   : > { %v1842_v54 = vpop.permute.xlu1 %619 }
 0x59e   : > { %1570 = vmatmul.mubr.msk.f32.vlgmr.msra.gmra.mrb[2].mxu0 %vm394_vm2, %v1842_v54 }
 0x59f   : > { %1629 = vmatpush3.bf16.msra.mxu0 %v1801_v11  ;;  %1583 = vmatprep.mubr.msk.f32.mxu0 %vm1737_vm0, %v1738_v1 }
 0x5a0   : > { %1633 = vmatprep.subr.bf16.mxu0 %v1736_v0 }
 0x671   : > { %v704_v55 = vpop.f32.mrb[2].mxu0 }
 0x672   : > { %v709_v56 = vrot.slane %v704_v55, 4  ;;  %v1571_v57 = vpop.f32.mrb[3].mxu0 }
 0x674   : > { %v711_v58 = vadd.f32 %v709_v56, %v1822_v19 }
 0x676   : > { %1680 = vtanh.f32 %v711_v58  ;;  %v1492_v60 = vmul.f32 -1.442695, %v711_v58 }
 0x678   : > { %1682 = vpow2.f32 %v1492_v60 }
 0x680   : > { %v1681_v59 = vpop.eup %1680 }
 0x681   : > { %724 = vrot.lane.b32.xlu0 %v1681_v59, %s1739_s9 }
 0x682   : > { %v1683_v61 = vpop.eup %1682 }
 0x683   : > { %v715_v62 = vadd.f32 1.0, %v1683_v61 }
 0x685   : > { %1684 = vrcp.f32 %v715_v62 }
 0x68f   : > { %v1685_v63 = vpop.eup %1684 }
 0x690   : > { %v722_v5 = vmul.f32 %v1685_v63, %v720_v4 }
 0x6f3   : > { %v725_v2 = vpop.permute.xlu0 %724 }
 0x6f4   : > { %v727_v3 = vmul.f32 %v1685_v63, %v725_v2 }
 0x6f6   : > { %729 = vrot.lane.b32.xlu1 %v727_v3, %s1740_s10 }
 0x768   : > { %v730_v6 = vpop.permute.xlu1 %729 }
 0x769   : > { %v732_v7 = vadd.f32 %v730_v6, %v722_v5 }
 0x76b   : > { %1686 = vtanh.f32 %v732_v7 }
 0x775   : > { %v1687_v8 = vpop.eup %1686 }
 0x776   : > { %735 = vrot.lane.b32.xlu0 %v1687_v8, %s1741_s11 }
 0x7e8   : > { %v736_v9 = vpop.permute.xlu0 %735 }
 0x7e9   : > { %v738_v10 = vmul.f32 %v1685_v63, %v736_v9 }
 0x7eb   : > { %v746_v12 = vrot.slane %v738_v10, 4 }
 0x7ed   : > { %747 = vrot.lane.b32.xlu1 %v746_v12, %s1742_s12 }
 0x85f   : > { %v1855_v13 = vpop.permute.xlu1 %747 }
 0x860   : > { %1577 = vmatmul.mubr.msk.f32.vlgmr.msra.gmra.mrb[4].mxu1 %vm394_vm2, %v1855_v13 }
 0x861   : > { %1632 = vmatpush3.bf16.msra.mxu1 %v1801_v11  ;;  %1590 = vmatprep.mubr.msk.f32.mxu1 %vm1737_vm0, %v1738_v1 }
 0x862   : > { %1636 = vmatprep.subr.bf16.mxu1 %v1736_v0  ;;  %v840_v0 = vrot.slane %v732_v7, 6 }
 0x933   : > { %v824_v14 = vpop.f32.mrb[4].mxu1 }
 0x934   : > { %v829_v15 = vrot.slane %v824_v14, 2  ;;  %v1578_v16 = vpop.f32.mrb[5].mxu1 }
 0x936   : > { %v831_v18 = vadd.f32 %v829_v15, %v1822_v19 }
 0x938   : > { %1688 = vtanh.f32 %v831_v18  ;;  %v1494_v21 = vmul.f32 -1.442695, %v831_v18 }
 0x93a   : > { %1690 = vpow2.f32 %v1494_v21 }
 0x942   : > { %v1689_v20 = vpop.eup %1688 }
 0x943   : > { %844 = vrot.lane.b32.xlu0 %v1689_v20, %s1739_s9 }
 0x944   : > { %v1691_v22 = vpop.eup %1690 }
 0x945   : > { %v835_v23 = vadd.f32 1.0, %v1691_v22 }
 0x947   : > { %1692 = vrcp.f32 %v835_v23 }
 0x951   : > { %v1693_v24 = vpop.eup %1692 }
 0x952   : > { %v842_v27 = vmul.f32 %v1693_v24, %v840_v0 }
 0x9b5   : > { %v845_v25 = vpop.permute.xlu0 %844 }
 0x9b6   : > { %v847_v26 = vmul.f32 %v1693_v24, %v845_v25 }
 0x9b8   : > { %849 = vrot.lane.b32.xlu1 %v847_v26, %s1740_s10 }
 0xa2a   : > { %v850_v28 = vpop.permute.xlu1 %849 }
 0xa2b   : > { %v852_v29 = vadd.f32 %v850_v28, %v842_v27  ;;  %v1743_v28 = vmov 0  }
 0xa2c   : > { %1657 = vset.pattern.permute.xlu1 %v1743_v28 }
 0xa2d   : > { %1694 = vtanh.f32 %v852_v29  ;;  %v957_v45 = vrot.slane %v852_v29, 6 }
 0xa37   : > { %v1695_v19 = vpop.eup %1694 }
 0xa38   : > { %855 = vrot.lane.b32.xlu0 %v1695_v19, %s1741_s11 }
 0xaaa   : > { %v856_v30 = vpop.permute.xlu0 %855 }
 0xaab   : > { %v858_v31 = vmul.f32 %v1693_v24, %v856_v30  ;;  %v1908_v30 = vld [vmem:[%s290_s16] sm:$0x3] }
 0xaac   : > { %vm493_vm3 = vcmp.eq.s32.totalorder %v1908_v30, 0  ;;  %vm611_vm4 = vcmp.eq.s32.totalorder %v1908_v30, 1  ;;  %vm739_vm5 = vcmp.eq.s32.totalorder %v1908_v30, 2  ;;  %vm859_vm6 = vcmp.eq.s32.totalorder %v1908_v30, 3 }
 0xaad   : > { %v866_v32 = vrot.slane %v858_v31, 6  ;;  %vm976_vm8 = vcmp.eq.s32.totalorder %v1908_v30, 4  ;;  %vm1102_vm13 = vcmp.eq.s32.totalorder %v1908_v30, 5  ;;  %vm1230_vm14 = vcmp.eq.s32.totalorder %v1908_v30, 6 }
 0xaaf   : > { %867 = vrot.lane.b32.xlu1 %v866_v32, %s1742_s12 }
 0xb21   : > { %v1868_v34 = vpop.permute.xlu1 %867 }
 0xb22   : > { %1584 = vmatmul.mubr.msk.f32.vlgmr.msra.gmra.mrb[4].mxu0 %vm394_vm2, %v1868_v34 }
 0xb23   : > { %1635 = vmatpush3.bf16.msra.mxu0 %v1801_v11  ;;  %1597 = vmatprep.mubr.msk.f32.mxu0 %vm1737_vm0, %v1738_v1 }
 0xbf5   : > { %v944_v35 = vpop.f32.mrb[4].mxu0 }
 0xbf6   : > { %v948_v36 = vadd.f32 %v944_v35, %v1820_v17  ;;  %v1585_v37 = vpop.f32.mrb[5].mxu0  ;;  %v494_v35 = vsel %vm493_vm3, 1, %v1743_v28 }
 0xbf7   : > { %v1744_v37 = vmov 1  }
 0xbf8   : > { %1696 = vtanh.f32 %v948_v36  ;;  %v1496_v39 = vmul.f32 -1.442695, %v948_v36  ;;  %1658 = vset.pattern.permute.xlu0 %v1744_v37 }
 0xbfa   : > { %1698 = vpow2.f32 %v1496_v39 }
 0xc02   : > { %v1697_v38 = vpop.eup %1696 }
 0xc03   : > { %961 = vrot.lane.b32.xlu0 %v1697_v38, %s1739_s9  ;;  %v612_v38 = vsel %vm611_vm4, 1, %v1743_v28 }
 0xc04   : > { %v1699_v40 = vpop.eup %1698 }
 0xc05   : > { %v952_v41 = vadd.f32 1.0, %v1699_v40 }
 0xc07   : > { %1700 = vrcp.f32 %v952_v41 }
 0xc11   : > { %v1701_v42 = vpop.eup %1700 }
 0xc12   : > { %v959_v46 = vmul.f32 %v1701_v42, %v957_v45  ;;  %v860_v45 = vsel %vm859_vm6, 1, %v1743_v28 }
 0xc75   : > { %v962_v43 = vpop.permute.xlu0 %961 }
 0xc76   : > { %v964_v44 = vmul.f32 %v1701_v42, %v962_v43 }
 0xc78   : > { %966 = vrot.lane.b32.xlu1 %v964_v44, %s1740_s10  ;;  %v740_v44 = vsel %vm739_vm5, 1, %v1743_v28 }
 0xcea   : > { %v967_v47 = vpop.permute.xlu1 %966 }
 0xceb   : > { %v969_v48 = vadd.f32 %v967_v47, %v959_v46 }
 0xced   : > { %1702 = vtanh.f32 %v969_v48 }
 0xcf7   : > { %v1703_v49 = vpop.eup %1702 }
 0xcf8   : > { %972 = vrot.lane.b32.xlu0 %v1703_v49, %s1741_s11 }
 0xd6a   : > { %v973_v50 = vpop.permute.xlu0 %972 }
 0xd6b   : > { %v1879_v51 = vmul.f32 %v1701_v42, %v973_v50 }
 0xd6d   : > { %997 = vrot.lane.b32.xlu1 %v1879_v51, %s1742_s12 }
 0xddf   : > { %v998_v52 = vpop.permute.xlu1 %997 }
 0xde0   : > { %1591 = vmatmul.mubr.msk.f32.vlgmr.msra.gmra.mrb[6].mxu1 %vm394_vm2, %v998_v52 }
 0xde1   : > { %1638 = vmatpush3.bf16.msra.mxu1 %v1801_v11  ;;  %1604 = vmatprep.mubr.msk.f32.mxu1 %vm1737_vm0, %v1738_v1  ;;  %v1083_v1 = vrot.slane %v969_v48, 6 }
 0xeb3   : > { %v1067_v53 = vpop.f32.mrb[6].mxu1 }
 0xeb4   : > { %v1072_v55 = vrot.slane %v1067_v53, 6  ;;  %v1592_v56 = vpop.f32.mrb[7].mxu1 }
 0xeb6   : > { %v1074_v57 = vadd.f32 %v1072_v55, %v1820_v17  ;;  %v977_v55 = vsel %vm976_vm8, 1, %v1743_v28 }
 0xeb8   : > { %1704 = vtanh.f32 %v1074_v57  ;;  %v1498_v59 = vmul.f32 -1.442695, %v1074_v57 }
 0xeba   : > { %1706 = vpow2.f32 %v1498_v59 }
 0xec2   : > { %v1705_v58 = vpop.eup %1704 }
 0xec3   : > { %1087 = vrot.lane.b32.xlu0 %v1705_v58, %s1739_s9 }
 0xec4   : > { %v1707_v60 = vpop.eup %1706 }
 0xec5   : > { %v1078_v61 = vadd.f32 1.0, %v1707_v60 }
 0xec7   : > { %1708 = vrcp.f32 %v1078_v61 }
 0xed1   : > { %v1709_v62 = vpop.eup %1708 }
 0xed2   : > { %v1085_v2 = vmul.f32 %v1709_v62, %v1083_v1 }
 0xf35   : > { %v1088_v63 = vpop.permute.xlu0 %1087 }
 0xf36   : > { %v1090_v11 = vmul.f32 %v1709_v62, %v1088_v63 }
 0xf38   : > { %1092 = vrot.lane.b32.xlu1 %v1090_v11, %s1740_s10 }
 0xfaa   : > { %v1093_v3 = vpop.permute.xlu1 %1092 }
 0xfab   : > { %v1095_v4 = vadd.f32 %v1093_v3, %v1085_v2 }
 0xfad   : > { %1710 = vtanh.f32 %v1095_v4  ;;  %v1211_v25 = vrot.slane %v1095_v4, 6 }
 0xfb7   : > { %v1711_v5 = vpop.eup %1710 }
 0xfb8   : > { %1098 = vrot.lane.b32.xlu0 %v1711_v5, %s1741_s11 }
0x102a   : > { %v1099_v6 = vpop.permute.xlu0 %1098 }
0x102b   : > { %v1101_v7 = vmul.f32 %v1709_v62, %v1099_v6 }
0x102d   : > { %v1109_v8 = vrot.slane %v1101_v7, 2 }
0x102f   : > { %1110 = vrot.lane.b32.xlu1 %v1109_v8, %s1742_s12  ;;  %v1103_v8 = vsel %vm1102_vm13, 1, %v1743_v28 }
0x10a1   : > { %v1892_v9 = vpop.permute.xlu1 %1110 }
0x10a2   : > { %1598 = vmatmul.mubr.msk.f32.vlgmr.msra.gmra.mrb[6].mxu0 %vm394_vm2, %v1892_v9 }
0x1175   : > { %v1195_v10 = vpop.f32.mrb[6].mxu0 }
0x1176   : > { %v1200_v12 = vrot.slane %v1195_v10, 4  ;;  %v1599_v14 = vpop.f32.mrb[7].mxu0 }
0x1178   : > { %v1202_v15 = vadd.f32 %v1200_v12, %v1820_v17 }
0x117a   : > { %1712 = vtanh.f32 %v1202_v15  ;;  %v1500_v18 = vmul.f32 -1.442695, %v1202_v15  ;;  %v1231_v15 = vsel %vm1230_vm14, 1, %v1743_v28 }
0x117c   : > { %1714 = vpow2.f32 %v1500_v18 }
0x1184   : > { %v1713_v16 = vpop.eup %1712 }
0x1185   : > { %1215 = vrot.lane.b32.xlu0 %v1713_v16, %s1739_s9 }
0x1186   : > { %v1715_v20 = vpop.eup %1714 }
0x1187   : > { %v1206_v21 = vadd.f32 1.0, %v1715_v20 }
0x1189   : > { %1716 = vrcp.f32 %v1206_v21 }
0x1193   : > { %v1717_v22 = vpop.eup %1716 }
0x1194   : > { %v1213_v26 = vmul.f32 %v1717_v22, %v1211_v25 }
0x11f7   : > { %v1216_v23 = vpop.permute.xlu0 %1215 }
0x11f8   : > { %v1218_v24 = vmul.f32 %v1717_v22, %v1216_v23 }
0x11fa   : > { %1220 = vrot.lane.b32.xlu1 %v1218_v24, %s1740_s10 }
0x126c   : > { %v1221_v0 = vpop.permute.xlu1 %1220 }
0x126d   : > { %v1899_v27 = vadd.f32 %v1221_v0, %v1213_v26 }
0x126f   : > { %1718 = vtanh.f32 %v1899_v27  ;;  %v1331_v59 = vrot.slane %v1899_v27, 6 }
0x1279   : > { %v1719_v29 = vpop.eup %1718 }
0x127a   : > { %1226 = vrot.lane.b32.xlu0 %v1719_v29, %s1741_s11 }
0x12ec   : > { %v1227_v19 = vpop.permute.xlu0 %1226 }
0x12ed   : > { %v1229_v31 = vmul.f32 %v1717_v22, %v1227_v19 }
0x12ef   : > { %v1237_v32 = vrot.slane %v1229_v31, 4 }
0x12f1   : > { %1238 = vrot.lane.b32.xlu1 %v1237_v32, %s1742_s12 }
0x12f5   : > { %496 = vperm.xlu1 %1657, %v494_v35  }
0x12f9   : > { %614 = vperm.xlu1 %1657, %v612_v38  }
0x1363   : > { %v1913_v36 = vpop.permute.xlu1 %1238 }
0x1364   : > { %1605 = vmatmul.mubr.msk.f32.vlgmr.msra.gmra.mrb[8].mxu1 %vm394_vm2, %v1913_v36  ;;  %vm1350_vm2 = vcmp.eq.s32.totalorder %v1908_v30, 7 }
0x1365   : > { %v1351_v18 = vsel %vm1350_vm2, 1, %v1743_v28 }
0x1374   : > { %v497_v52 = vpop.permute.xlu1 %496 }
0x1375   : > { %vm498_vm7 = vcmp.eq.s32.totalorder %v497_v52, 1 }
0x1376   : > { %v499_v53 = vsel %vm498_vm7, %v1828_v33, 0.0 }
0x1378   : > { %v615_v58 = vpop.permute.xlu1 %614 }
0x1379   : > { %vm616_vm15 = vcmp.eq.s32.totalorder %v615_v58, 1 }
0x1437   : > { %v1315_v39 = vpop.f32.mrb[8].mxu1 }
0x1438   : > { %v1320_v40 = vrot.slane %v1315_v39, 2  ;;  %v1606_v41 = vpop.f32.mrb[9].mxu1 }
0x143a   : > { %v1322_v42 = vadd.f32 %v1320_v40, %v1820_v17 }
0x143c   : > { %1720 = vtanh.f32 %v1322_v42  ;;  %v1502_v46 = vmul.f32 -1.442695, %v1322_v42 }
0x143e   : > { %1722 = vpow2.f32 %v1502_v46 }
0x1446   : > { %v1721_v43 = vpop.eup %1720 }
0x1447   : > { %1335 = vrot.lane.b32.xlu0 %v1721_v43, %s1739_s9 }
0x1448   : > { %v1723_v47 = vpop.eup %1722 }
0x1449   : > { %v1326_v17 = vadd.f32 1.0, %v1723_v47 }
0x144b   : > { %501 = vperm.xlu0 %1658, %v494_v35   ;;  %1724 = vrcp.f32 %v1326_v17 }
0x144f   : > { %628 = vperm.xlu0 %1658, %v612_v38  }
0x1453   : > { %752 = vperm.xlu0 %1658, %v740_v44  }
0x1455   : > { %v1926_v48 = vpop.eup %1724 }
0x1456   : > { %v1333_v60 = vmul.f32 %v1926_v48, %v1331_v59 }
0x1457   : > { %872 = vperm.xlu0 %1658, %v860_v45  }
0x14b9   : > { %v1336_v49 = vpop.permute.xlu0 %1335 }
0x14ba   : > { %v1338_v50 = vmul.f32 %v1926_v48, %v1336_v49 }
0x14bc   : > { %1340 = vrot.lane.b32.xlu1 %v1338_v50, %s1740_s10 }
0x14c0   : > { %742 = vperm.xlu1 %1657, %v740_v44  }
0x14c4   : > { %862 = vperm.xlu1 %1657, %v860_v45  }
0x14c8   : > { %623 = vrot.lane.b32.xlu1 %v499_v53, %s1742_s12 }
0x14ca   : > { %v502_v56 = vpop.permute.xlu0 %501 }
0x14cb   : > { %vm503_vm9 = vcmp.eq.s32.totalorder %v502_v56, 1 }
0x14cc   : > { %v504_v57 = vsel %vm503_vm9, %v1828_v33, 0.0  ;;  %979 = vperm.xlu1 %1657, %v977_v55   ;;  %vm1367_vm9 = vcmask 123904  }
0x14cd   : > { %632 = vrot.lane.b32.xlu0 %v504_v57, %s1742_s12 }
0x14ce   : > { %v629_v62 = vpop.permute.xlu0 %628 }
0x14cf   : > { %vm630_vm10 = vcmp.eq.s32.totalorder %v629_v62, 1 }
0x14d0   : > { %1660 = vset.pattern.permute.xlu1 %v1744_v37 }
0x14d1   : > { %988 = vperm.xlu0 %1658, %v977_v55  }
0x14d2   : > { %v753_v11 = vpop.permute.xlu0 %752 }
0x14d3   : > { %vm754_vm11 = vcmp.eq.s32.totalorder %v753_v11, 1 }
0x14d5   : > { %1659 = vset.pattern.permute.xlu0 %v1743_v28 }
0x14d6   : > { %v873_v33 = vpop.permute.xlu0 %872 }
0x14d7   : > { %vm874_vm12 = vcmp.eq.s32.totalorder %v873_v33, 1 }
0x152e   : > { %v1341_v61 = vpop.permute.xlu1 %1340 }
0x152f   : > { %v1343_v63 = vadd.f32 %v1341_v61, %v1333_v60 }
0x1531   : > { %1726 = vtanh.f32 %v1343_v63 }
0x153b   : > { %v1727_v1 = vpop.eup %1726 }
0x153c   : > { %1346 = vrot.lane.b32.xlu1 %v1727_v1, %s1741_s11 }
0x153f   : > { %v633_v2 = vpop.permute.xlu0 %632  ;;  %v743_v3 = vpop.permute.xlu1 %742 }
0x1540   : > { %v635_v4 = vsel %vm630_vm10, %v1842_v54, %v633_v2  ;;  %vm744_vm0 = vcmp.eq.s32.totalorder %v743_v3, 1 }
0x1541   : > { %v755_v5 = vsel %vm754_vm11, %v1855_v13, %v635_v4 }
0x1542   : > { %v875_v6 = vsel %vm874_vm12, %v1868_v34, %v755_v5 }
0x1543   : > { %v863_v7 = vpop.permute.xlu1 %862  ;;  %992 = vrot.lane.b32.xlu1 %v875_v6, %s1745_s17 }
0x1544   : > { %vm864_vm1 = vcmp.eq.s32.totalorder %v863_v7, 1 }
0x1547   : > { %v624_v10 = vpop.permute.xlu1 %623  ;;  %1119 = vperm.xlu1 %1660, %v1103_v8  }
0x1548   : > { %v626_v12 = vsel %vm616_vm15, %v1842_v54, %v624_v10 }
0x1549   : > { %v750_v14 = vsel %vm744_vm0, %v1855_v13, %v626_v12 }
0x154a   : > { %v870_v16 = vsel %vm864_vm1, %v1868_v34, %v750_v14 }
0x154b   : > { %983 = vrot.lane.b32.xlu0 %v870_v16, %s1745_s17  ;;  %1661 = vset.pattern.permute.xlu1 %v1743_v28  ;;  %v980_v54 = vpop.permute.xlu1 %979 }
0x154c   : > { %1233 = vperm.xlu1 %1661, %v1231_v15   ;;  %vm981_vm4 = vcmp.eq.s32.totalorder %v980_v54, 1 }
0x154f   : > { %1105 = vperm.xlu0 %1659, %v1103_v8  }
0x1550   : > { %1353 = vperm.xlu1 %1661, %v1351_v18   ;;  %v989_v20 = vpop.permute.xlu0 %988 }
0x1551   : > { %vm990_vm3 = vcmp.eq.s32.totalorder %v989_v20, 1 }
0x1553   : > { %1662 = vset.pattern.permute.xlu0 %v1744_v37 }
0x1554   : > { %1663 = vset.pattern.permute.xlu1 %v1744_v37  ;;  %1243 = vperm.xlu0 %1662, %v1231_v15  }
0x1555   : > { %1363 = vperm.xlu1 %1663, %v1351_v18  }
0x15ae   : > { %v1347_v13 = vpop.permute.xlu1 %1346 }
0x15af   : > { %v1349_v22 = vmul.f32 %v1926_v48, %v1347_v13 }
0x15b1   : > { %v1357_v25 = vrot.slane %v1349_v22, 6 }
0x15b5   : > { %v993_v34 = vpop.permute.xlu1 %992 }
0x15b6   : > { %v995_v21 = vsel %vm990_vm3, %v1879_v51, %v993_v34 }
0x15b7   : > { %1123 = vrot.lane.b32.xlu1 %v995_v21, %s1742_s12 }
0x15bd   : > { %v984_v23 = vpop.permute.xlu0 %983 }
0x15be   : > { %v986_v24 = vsel %vm981_vm4, %v1879_v51, %v984_v23 }
0x15bf   : > { %1114 = vrot.lane.b32.xlu0 %v986_v24, %s1742_s12 }
0x15c3   : > { %1358 = vrot.lane.b32.xlu0 %v1357_v25, %s1742_s12 }
0x15c6   : > { %v1120_v26 = vpop.permute.xlu1 %1119 }
0x15c7   : > { %vm1121_vm5 = vcmp.eq.s32.totalorder %v1120_v26, 1 }
0x15cb   : > { %v1234_v0 = vpop.permute.xlu1 %1233 }
0x15cc   : > { %vm1235_vm8 = vcmp.eq.s32.totalorder %v1234_v0, 1 }
0x15ce   : > { %v1106_v28 = vpop.permute.xlu0 %1105 }
0x15cf   : > { %v1354_v27 = vpop.permute.xlu1 %1353  ;;  %vm1107_vm6 = vcmp.eq.s32.totalorder %v1106_v28, 1 }
0x15d0   : > { %vm1355_vm10 = vcmp.eq.s32.totalorder %v1354_v27, 1 }
0x15d3   : > { %v1244_v19 = vpop.permute.xlu0 %1243 }
0x15d4   : > { %v1364_v29 = vpop.permute.xlu1 %1363  ;;  %vm1245_vm7 = vcmp.eq.s32.totalorder %v1244_v19, 1 }
0x15d5   : > { %vm1365_vm11 = vcmp.eq.s32.totalorder %v1364_v29, 1 }
0x1629   : > { %v1124_v30 = vpop.permute.xlu1 %1123 }
0x162a   : > { %v1126_v32 = vsel %vm1121_vm5, %v1892_v9, %v1124_v30 }
0x162b   : > { %v1246_v38 = vsel %vm1245_vm7, %v1913_v36, %v1126_v32 }
0x1631   : > { %v1115_v31 = vpop.permute.xlu0 %1114 }
0x1632   : > { %v1117_v51 = vsel %vm1107_vm6, %v1892_v9, %v1115_v31 }
0x1633   : > { %v1241_v37 = vsel %vm1235_vm8, %v1913_v36, %v1117_v51 }
0x1635   : > { %v1359_v35 = vpop.permute.xlu0 %1358 }
0x1636   : > { %v1361_v39 = vsel %vm1355_vm10, %v1359_v35, %v1241_v37  ;;  %v1366_v40 = vsel %vm1365_vm11, %v1359_v35, %v1246_v38 }
0x1637   : > { %1368 = vst.msk [vmem:[%s295_s23] sm:$0x3] %vm1367_vm9, %v1361_v39  ;;  %1503 = vst.msk [vmem:[%s295_s23 + $0x2] sm:$0x3] %vm1367_vm9, %v1366_v40 }
0x1638 PF: > { %s15_s18 = sadd.s32 1, %s1734_s18  }
0x1639   : > { %p12_p4 = scmp.ge.s32.totalorder %s15_s18, 4  }
0x163b   :  { %14 = sbr.rel (!%p12_p4) target bundleno = 1 (0x1), region = 83 }

</bundles_post_ra>
